<compile_context>
chip_gen: v7x
topology: tpu7x:2x2x1
jax: 0.10.0
libtpu: 0.0.40
codegen_flags: <defaults>
</compile_context>

<pallas_src>
import jax
import jax.numpy as jnp
from jax import lax
from jax.experimental import pallas as pl
from jax.experimental.pallas import tpu as pltpu


def cnn_block_kernel(x_ref, w_ref, bias_ref, o_ref, pad_ref):
    # x_ref:    (nb, Hp, 2, Wp, 2, Cin)  pool window on its own axes
    # w_ref:    (9*Cin, Cout)            im2col weights, BN scale folded in
    # bias_ref: (1, Cout)                folded BN shift (incl. conv bias)
    # o_ref:    (nb, Hp, Wp, Cout)
    # pad_ref:  (nb, Hp+2, Wp+2, Cin)    zero-padded pooled image (VMEM scratch)
    nb, hp, wp, cout = o_ref.shape
    cin = pad_ref.shape[-1]

    # ---- 2x2 max-pool: plain VPU maxes over the two pool-window axes ----
    v = x_ref[...]                                      # (nb, Hp, 2, Wp, 2, Cin)
    a = jnp.maximum(v[:, :, 0], v[:, :, 1])             # (nb, Hp, Wp, 2, Cin)
    pooled = jnp.maximum(a[:, :, :, 0], a[:, :, :, 1])  # (nb, Hp, Wp, Cin)

    # ---- SAME-pad: zero only the 1-px border (interior fully overwritten) ----
    zrow = jnp.zeros((nb, 1, wp + 2, cin), jnp.float32)
    zcol = jnp.zeros((nb, hp + 2, 1, cin), jnp.float32)
    pad_ref[:, pl.ds(0, 1), :, :] = zrow
    pad_ref[:, pl.ds(hp + 1, 1), :, :] = zrow
    pad_ref[:, :, pl.ds(0, 1), :] = zcol
    pad_ref[:, :, pl.ds(wp + 1, 1), :] = zcol
    pad_ref[:, pl.ds(1, hp), pl.ds(1, wp), :] = pooled

    # ---- im2col: one matmul over all 9 taps and the whole batch chunk ----
    patches = []
    for k in range(9):
        dy, dx = k // 3, k % 3
        patches.append(pad_ref[:, pl.ds(dy, hp), pl.ds(dx, wp), :])
    patch = jnp.concatenate(patches, axis=-1)           # (nb, Hp, Wp, 9*Cin)
    patch = patch.reshape(nb * hp * wp, 9 * cin).astype(w_ref.dtype)

    acc = jnp.dot(patch, w_ref[...], preferred_element_type=jnp.float32)

    # ---- folded BN bias + ReLU ----
    y = jnp.maximum(acc + bias_ref[...], 0.0)
    # TODO(synk): a lane-dense (..., Wp*Cout) output slab would cut masked
    # stores further when Cout << 128 (v5e), at the cost of an in-kernel
    # relayout; the natural NHWC tile is kept here.
    o_ref[...] = y.reshape(nb, hp, wp, cout).astype(o_ref.dtype)


def _pick_batch_block(n, hp, wp, cin, cout, budget_bytes=8 * 1024 * 1024):
    """Largest divisor of n whose per-step VMEM working set fits the budget."""
    per_img = 4 * (2 * (hp * 2 * wp * 2 * cin)        # input block (x2 buffers)
                   + (hp + 2) * (wp + 2) * cin        # padded scratch
                   + hp * wp * 9 * cin                # im2col patch matrix
                   + 2 * (hp * wp * cout))            # output block (x2 buffers)
    nb = max(1, min(n, budget_bytes // max(per_img, 1)))
    while n % nb != 0:
        nb -= 1
    return nb


def cnn_block_forward(x_nchw, w_hwio, conv_bias, gamma, beta, run_mean,
                      run_var, eps=1e-5, mxu_dtype=jnp.float32):
    # mxu_dtype=jnp.bfloat16 enables the v6e/v7x fast MXU path (f32 accumulation
    # is kept via preferred_element_type); default f32 for bit-accurate checks.
    n, cin, h, w = x_nchw.shape
    kh, kw, _, cout = w_hwio.shape
    assert (kh, kw) == (3, 3)
    hp, wp = h // 2, w // 2

    # NCHW -> NHWC; crop any odd trailing row/col (MaxPool2d floor mode), then
    # expose the 2x2 pool window on its own axes (metadata-only reshape).
    x_nhwc = jnp.transpose(x_nchw, (0, 2, 3, 1)).astype(jnp.float32)
    x6 = x_nhwc[:, :2 * hp, :2 * wp, :].reshape(n, hp, 2, wp, 2, cin)

    # Fold BN scale into the conv weights (eval mode); fold conv bias + BN
    # shift into a single per-channel bias.
    inv_std = 1.0 / jnp.sqrt(run_var.astype(jnp.float32) + eps)
    scale = gamma.astype(jnp.float32) * inv_std                       # (Cout,)
    w_folded = (w_hwio.astype(jnp.float32) * scale[None, None, None, :])
    w_folded = w_folded.reshape(9 * cin, cout).astype(mxu_dtype)
    bias = (beta.astype(jnp.float32)
            + (conv_bias.astype(jnp.float32) - run_mean.astype(jnp.float32))
            * scale).reshape(1, cout)

    nb = _pick_batch_block(n, hp, wp, cin, cout)

    out_nhwc = pl.pallas_call(
        cnn_block_kernel,
        out_shape=jax.ShapeDtypeStruct((n, hp, wp, cout), jnp.float32),
        grid=(n // nb,),
        in_specs=[
            pl.BlockSpec((nb, hp, 2, wp, 2, cin),
                         lambda i: (i, 0, 0, 0, 0, 0)),
            pl.BlockSpec((9 * cin, cout), lambda i: (0, 0)),
            pl.BlockSpec((1, cout), lambda i: (0, 0)),
        ],
        out_specs=pl.BlockSpec((nb, hp, wp, cout), lambda i: (i, 0, 0, 0)),
        scratch_shapes=[pltpu.VMEM((nb, hp + 2, wp + 2, cin), jnp.float32)],
        compiler_params=pltpu.CompilerParams(
            dimension_semantics=("parallel",),
            vmem_limit_bytes=32 * 1024 * 1024),
    )(x6, w_folded, bias)

    return jnp.transpose(out_nhwc, (0, 3, 1, 2))  # back to NCHW


def cnn_block_reference(x_nchw, w_hwio, conv_bias, gamma, beta, run_mean,
                        run_var, eps=1e-5):
    x = jnp.transpose(x_nchw, (0, 2, 3, 1))
    pooled = lax.reduce_window(x, -jnp.inf, lax.max,
                               (1, 2, 2, 1), (1, 2, 2, 1), "VALID")
    conv = lax.conv_general_dilated(pooled, w_hwio, (1, 1), "SAME",
                                    dimension_numbers=("NHWC", "HWIO", "NHWC"))
    conv = conv + conv_bias
    y = (conv - run_mean) / jnp.sqrt(run_var + eps) * gamma + beta
    y = jnp.maximum(y, 0.0)
    return jnp.transpose(y, (0, 3, 1, 2))


if __name__ == "__main__":
    key = jax.random.PRNGKey(0)
    k = jax.random.split(key, 7)

    N, Cin, H, W = 2, 4, 16, 16
    Cout = 8

    x = jax.random.normal(k[0], (N, Cin, H, W), jnp.float32)
    w_hwio = 0.1 * jax.random.normal(k[1], (3, 3, Cin, Cout), jnp.float32)
    conv_bias = 0.1 * jax.random.normal(k[2], (Cout,), jnp.float32)
    gamma = 1.0 + 0.1 * jax.random.normal(k[3], (Cout,), jnp.float32)
    beta = 0.1 * jax.random.normal(k[4], (Cout,), jnp.float32)
    run_mean = 0.1 * jax.random.normal(k[5], (Cout,), jnp.float32)
    run_var = 0.5 + jnp.abs(jax.random.normal(k[6], (Cout,), jnp.float32))

    out = cnn_block_forward(x, w_hwio, conv_bias, gamma, beta, run_mean,
                            run_var)
    out = jax.block_until_ready(out)

    ref = cnn_block_reference(x, w_hwio, conv_bias, gamma, beta, run_mean,
                              run_var)
    assert out.shape == (N, Cout, H // 2, W // 2), out.shape
    assert jnp.allclose(out, ref, rtol=1e-4, atol=1e-4), \
        float(jnp.max(jnp.abs(out - ref)))

    print("KERNEL_OK")
</pallas_src>

<mosaic_0001>
module attributes {stable_mosaic.version = 11 : i64} {
  func.func @cnn_block_kernel(%arg0: i32, %arg1: memref<2x8x2x8x2x4xf32, #tpu.memory_space<vmem>>, %arg2: memref<36x8xf32, #tpu.memory_space<vmem>>, %arg3: memref<1x8xf32, #tpu.memory_space<vmem>>, %arg4: memref<2x8x8x8xf32, #tpu.memory_space<vmem>>, %arg5: memref<2x10x10x4xf32, #tpu.memory_space<vmem>>) attributes {dimension_semantics = [#tpu.dimension_semantics<parallel>], iteration_bounds = array<i64: 1>, scalar_prefetch = 0 : i64, scratch_operands = 1 : i64, tpu.core_type = #tpu.core_type<tc>, window_params = [{transform_indices = @transform_0, window_bounds = array<i64: 2, 8, 2, 8, 2, 4>}, {pipeline_mode = #tpu.pipeline_mode<synchronous>, transform_indices = @transform_1, window_bounds = array<i64: 36, 8>}, {pipeline_mode = #tpu.pipeline_mode<synchronous>, transform_indices = @transform_2, window_bounds = array<i64: 1, 8>}, {transform_indices = @transform_3, window_bounds = array<i64: 2, 8, 8, 8>}]} {
    %c0 = arith.constant 0 : index
    %c0_0 = arith.constant 0 : index
    %c0_1 = arith.constant 0 : index
    %c0_2 = arith.constant 0 : index
    %c0_3 = arith.constant 0 : index
    %c0_4 = arith.constant 0 : index
    %0 = vector.load %arg1[%c0, %c0_0, %c0_1, %c0_2, %c0_3, %c0_4] : memref<2x8x2x8x2x4xf32, #tpu.memory_space<vmem>>, vector<2x8x2x8x2x4xf32>
    %1 = vector.extract_strided_slice %0 {offsets = [0, 0, 0, 0, 0, 0], sizes = [2, 8, 1, 8, 2, 4], strides = [1, 1, 1, 1, 1, 1]} : vector<2x8x2x8x2x4xf32> to vector<2x8x1x8x2x4xf32>
    %2 = vector.shape_cast %1 : vector<2x8x1x8x2x4xf32> to vector<2x8x8x2x4xf32>
    %3 = vector.extract_strided_slice %0 {offsets = [0, 0, 1, 0, 0, 0], sizes = [2, 8, 1, 8, 2, 4], strides = [1, 1, 1, 1, 1, 1]} : vector<2x8x2x8x2x4xf32> to vector<2x8x1x8x2x4xf32>
    %4 = vector.shape_cast %3 : vector<2x8x1x8x2x4xf32> to vector<2x8x8x2x4xf32>
    %5 = arith.maximumf %2, %4 : vector<2x8x8x2x4xf32>
    %6 = vector.extract_strided_slice %5 {offsets = [0, 0, 0, 0, 0], sizes = [2, 8, 8, 1, 4], strides = [1, 1, 1, 1, 1]} : vector<2x8x8x2x4xf32> to vector<2x8x8x1x4xf32>
    %7 = vector.shape_cast %6 : vector<2x8x8x1x4xf32> to vector<2x8x8x4xf32>
    %8 = vector.extract_strided_slice %5 {offsets = [0, 0, 0, 1, 0], sizes = [2, 8, 8, 1, 4], strides = [1, 1, 1, 1, 1]} : vector<2x8x8x2x4xf32> to vector<2x8x8x1x4xf32>
    %9 = vector.shape_cast %8 : vector<2x8x8x1x4xf32> to vector<2x8x8x4xf32>
    %10 = arith.maximumf %7, %9 : vector<2x8x8x4xf32>
    %cst = arith.constant 0.000000e+00 : f32
    %11 = vector.broadcast %cst : f32 to vector<2x1x10x4xf32>
    %cst_5 = arith.constant 0.000000e+00 : f32
    %12 = vector.broadcast %cst_5 : f32 to vector<2x10x1x4xf32>
    %c0_6 = arith.constant 0 : index
    %c0_7 = arith.constant 0 : index
    %c0_8 = arith.constant 0 : index
    %c0_9 = arith.constant 0 : index
    %13 = vector.load %arg5[%c0_6, %c0_7, %c0_8, %c0_9] : memref<2x10x10x4xf32, #tpu.memory_space<vmem>>, vector<2x1x10x4xf32>
    tpu.vector_store %arg5[%c0_6, %c0_7, %c0_8, %c0_9], %11 {strides = array<i32>} : memref<2x10x10x4xf32, #tpu.memory_space<vmem>>, vector<2x1x10x4xf32>,
    %c0_10 = arith.constant 0 : index
    %c9 = arith.constant 9 : index
    %c0_11 = arith.constant 0 : index
    %c0_12 = arith.constant 0 : index
    %14 = vector.load %arg5[%c0_10, %c9, %c0_11, %c0_12] : memref<2x10x10x4xf32, #tpu.memory_space<vmem>>, vector<2x1x10x4xf32>
    tpu.vector_store %arg5[%c0_10, %c9, %c0_11, %c0_12], %11 {strides = array<i32>} : memref<2x10x10x4xf32, #tpu.memory_space<vmem>>, vector<2x1x10x4xf32>,
    %c0_13 = arith.constant 0 : index
    %c0_14 = arith.constant 0 : index
    %c0_15 = arith.constant 0 : index
    %c0_16 = arith.constant 0 : index
    %15 = vector.load %arg5[%c0_13, %c0_14, %c0_15, %c0_16] : memref<2x10x10x4xf32, #tpu.memory_space<vmem>>, vector<2x10x1x4xf32>
    tpu.vector_store %arg5[%c0_13, %c0_14, %c0_15, %c0_16], %12 {strides = array<i32>} : memref<2x10x10x4xf32, #tpu.memory_space<vmem>>, vector<2x10x1x4xf32>,
    %c0_17 = arith.constant 0 : index
    %c0_18 = arith.constant 0 : index
    %c9_19 = arith.constant 9 : index
    %c0_20 = arith.constant 0 : index
    %16 = vector.load %arg5[%c0_17, %c0_18, %c9_19, %c0_20] : memref<2x10x10x4xf32, #tpu.memory_space<vmem>>, vector<2x10x1x4xf32>
    tpu.vector_store %arg5[%c0_17, %c0_18, %c9_19, %c0_20], %12 {strides = array<i32>} : memref<2x10x10x4xf32, #tpu.memory_space<vmem>>, vector<2x10x1x4xf32>,
    %c0_21 = arith.constant 0 : index
    %c1 = arith.constant 1 : index
    %c1_22 = arith.constant 1 : index
    %c0_23 = arith.constant 0 : index
    %17 = vector.load %arg5[%c0_21, %c1, %c1_22, %c0_23] : memref<2x10x10x4xf32, #tpu.memory_space<vmem>>, vector<2x8x8x4xf32>
    tpu.vector_store %arg5[%c0_21, %c1, %c1_22, %c0_23], %10 {strides = array<i32>} : memref<2x10x10x4xf32, #tpu.memory_space<vmem>>, vector<2x8x8x4xf32>,
    %c0_24 = arith.constant 0 : index
    %c0_25 = arith.constant 0 : index
    %c0_26 = arith.constant 0 : index
    %c0_27 = arith.constant 0 : index
    %18 = vector.load %arg5[%c0_24, %c0_25, %c0_26, %c0_27] : memref<2x10x10x4xf32, #tpu.memory_space<vmem>>, vector<2x8x8x4xf32>
    %c0_28 = arith.constant 0 : index
    %c0_29 = arith.constant 0 : index
    %c1_30 = arith.constant 1 : index
    %c0_31 = arith.constant 0 : index
    %19 = vector.load %arg5[%c0_28, %c0_29, %c1_30, %c0_31] : memref<2x10x10x4xf32, #tpu.memory_space<vmem>>, vector<2x8x8x4xf32>
    %c0_32 = arith.constant 0 : index
    %c0_33 = arith.constant 0 : index
    %c2 = arith.constant 2 : index
    %c0_34 = arith.constant 0 : index
    %20 = vector.load %arg5[%c0_32, %c0_33, %c2, %c0_34] : memref<2x10x10x4xf32, #tpu.memory_space<vmem>>, vector<2x8x8x4xf32>
    %c0_35 = arith.constant 0 : index
    %c1_36 = arith.constant 1 : index
    %c0_37 = arith.constant 0 : index
    %c0_38 = arith.constant 0 : index
    %21 = vector.load %arg5[%c0_35, %c1_36, %c0_37, %c0_38] : memref<2x10x10x4xf32, #tpu.memory_space<vmem>>, vector<2x8x8x4xf32>
    %c0_39 = arith.constant 0 : index
    %c1_40 = arith.constant 1 : index
    %c1_41 = arith.constant 1 : index
    %c0_42 = arith.constant 0 : index
    %22 = vector.load %arg5[%c0_39, %c1_40, %c1_41, %c0_42] : memref<2x10x10x4xf32, #tpu.memory_space<vmem>>, vector<2x8x8x4xf32>
    %c0_43 = arith.constant 0 : index
    %c1_44 = arith.constant 1 : index
    %c2_45 = arith.constant 2 : index
    %c0_46 = arith.constant 0 : index
    %23 = vector.load %arg5[%c0_43, %c1_44, %c2_45, %c0_46] : memref<2x10x10x4xf32, #tpu.memory_space<vmem>>, vector<2x8x8x4xf32>
    %c0_47 = arith.constant 0 : index
    %c2_48 = arith.constant 2 : index
    %c0_49 = arith.constant 0 : index
    %c0_50 = arith.constant 0 : index
    %24 = vector.load %arg5[%c0_47, %c2_48, %c0_49, %c0_50] : memref<2x10x10x4xf32, #tpu.memory_space<vmem>>, vector<2x8x8x4xf32>
    %c0_51 = arith.constant 0 : index
    %c2_52 = arith.constant 2 : index
    %c1_53 = arith.constant 1 : index
    %c0_54 = arith.constant 0 : index
    %25 = vector.load %arg5[%c0_51, %c2_52, %c1_53, %c0_54] : memref<2x10x10x4xf32, #tpu.memory_space<vmem>>, vector<2x8x8x4xf32>
    %c0_55 = arith.constant 0 : index
    %c2_56 = arith.constant 2 : index
    %c2_57 = arith.constant 2 : index
    %c0_58 = arith.constant 0 : index
    %26 = vector.load %arg5[%c0_55, %c2_56, %c2_57, %c0_58] : memref<2x10x10x4xf32, #tpu.memory_space<vmem>>, vector<2x8x8x4xf32>
    %27 = tpu.concatenate %18, %19, %20, %21, %22, %23, %24, %25, %26 in 3 : vector<2x8x8x4xf32>, vector<2x8x8x4xf32>, vector<2x8x8x4xf32>, vector<2x8x8x4xf32>, vector<2x8x8x4xf32>, vector<2x8x8x4xf32>, vector<2x8x8x4xf32>, vector<2x8x8x4xf32>, vector<2x8x8x4xf32> -> vector<2x8x8x36xf32>
    %28 = vector.shape_cast %27 : vector<2x8x8x36xf32> to vector<128x36xf32>
    %c0_59 = arith.constant 0 : index
    %c0_60 = arith.constant 0 : index
    %29 = vector.load %arg2[%c0_59, %c0_60] : memref<36x8xf32, #tpu.memory_space<vmem>>, vector<36x8xf32>
    %cst_61 = arith.constant dense<0.000000e+00> : vector<128x8xf32>
    %30 = tpu.matmul %28, %29, %cst_61 {dimension_numbers = #tpu.dot_dimension_numbers<[1], [0], [0], [1], [0, 0, 1, 1], [], []>} : vector<128x36xf32>, vector<36x8xf32>, vector<128x8xf32> -> vector<128x8xf32>
    %c0_62 = arith.constant 0 : index
    %c0_63 = arith.constant 0 : index
    %31 = vector.load %arg3[%c0_62, %c0_63] : memref<1x8xf32, #tpu.memory_space<vmem>>, vector<1x8xf32>
    %32 = vector.broadcast %31 : vector<1x8xf32> to vector<128x8xf32>
    %33 = arith.addf %30, %32 : vector<128x8xf32>
    %cst_64 = arith.constant 0.000000e+00 : f32
    %34 = vector.broadcast %cst_64 : f32 to vector<128x8xf32>
    %35 = arith.maximumf %33, %34 : vector<128x8xf32>
    %36 = vector.shape_cast %35 : vector<128x8xf32> to vector<2x8x8x8xf32>
    %c0_65 = arith.constant 0 : index
    %c0_66 = arith.constant 0 : index
    %c0_67 = arith.constant 0 : index
    %c0_68 = arith.constant 0 : index
    %37 = vector.load %arg4[%c0_65, %c0_66, %c0_67, %c0_68] : memref<2x8x8x8xf32, #tpu.memory_space<vmem>>, vector<2x8x8x8xf32>
    tpu.vector_store %arg4[%c0_65, %c0_66, %c0_67, %c0_68], %36 {strides = array<i32>} : memref<2x8x8x8xf32, #tpu.memory_space<vmem>>, vector<2x8x8x8xf32>,
    return
  }
  func.func @transform_0(%arg0: i32) -> (i32, i32, i32, i32, i32, i32) {
    %c0_i32 = arith.constant 0 : i32
    %c0_i32_0 = arith.constant 0 : i32
    %c0_i32_1 = arith.constant 0 : i32
    %c0_i32_2 = arith.constant 0 : i32
    %c0_i32_3 = arith.constant 0 : i32
    %c0_i32_4 = arith.constant 0 : i32
    return %arg0, %c0_i32, %c0_i32_0, %c0_i32_1, %c0_i32_2, %c0_i32_3 : i32, i32, i32, i32, i32, i32
  }
  func.func @transform_1(%arg0: i32) -> (i32, i32) {
    %c0_i32 = arith.constant 0 : i32
    %c0_i32_0 = arith.constant 0 : i32
    %c0_i32_1 = arith.constant 0 : i32
    return %c0_i32, %c0_i32_0 : i32, i32
  }
  func.func @transform_2(%arg0: i32) -> (i32, i32) {
    %c0_i32 = arith.constant 0 : i32
    %c0_i32_0 = arith.constant 0 : i32
    %c0_i32_1 = arith.constant 0 : i32
    return %c0_i32, %c0_i32_0 : i32, i32
  }
  func.func @transform_3(%arg0: i32) -> (i32, i32, i32, i32) {
    %c0_i32 = arith.constant 0 : i32
    %c0_i32_0 = arith.constant 0 : i32
    %c0_i32_1 = arith.constant 0 : i32
    %c0_i32_2 = arith.constant 0 : i32
    return %arg0, %c0_i32, %c0_i32_0, %c0_i32_1 : i32, i32, i32, i32
  }
}

</mosaic_0001>

<bundles_post_ra>
// kernel: tpu_custom_call.1
= control target key start
LH: loop header
LB: loop body
LE: loop exit
PB: predicated region body
PF: predicated region fallthrough
CT: control target
= control target key end

     0   :  { %vm911_vm0 = vcmask 31744   ;;  %vm913_vm1 = vcmask 25600   ;;  %vm922_vm2 = vcmask 24576   ;;  %v2529_v0 = vmov 0.0   ;;  %s2530_s17 = smov 4   ;;  %s2531_s18 = smov 8   ;;  %s4143_s0 = inlined_call_operand.vmem [shape: f32[2,8,2,8,2,4], index: 0, kind: input, shape index: {}]   ;;  %s4144_s1 = inlined_call_operand.vmem [shape: f32[36,8], index: 1, kind: input, shape index: {}]   ;;  %s4145_s2 = inlined_call_operand.vmem [shape: f32[1,8], index: 2, kind: input, shape index: {}]   ;;  %s4146_s3 = inlined_call_operand.hbm [shape: f32[2,8,8,8], index: 3, kind: output, shape index: {}]  }
   0x1   :  { %912 = vst.msk [vmem:[#allocation2] sm:$0xff] %vm911_vm0, %v2529_v0  ;;  %915 = vst.msk [vmem:[#allocation2 + $0xa0] sm:$0xff] %vm911_vm0, %v2529_v0  ;;  %v15_v1 = vld [vmem:[%s4143_s0] sm:$0x3]  ;;  %v16_v2 = vld [vmem:[%s4143_s0 + $0x2] sm:$0x3] }
   0x2   :  { %914 = vst.msk [vmem:[#allocation2 + $0x8] sm:$0x3] %vm913_vm1, %v2529_v0  ;;  %916 = vst.msk [vmem:[#allocation2 + $0xa8] sm:$0x3] %vm913_vm1, %v2529_v0  ;;  %v17_v3 = vld [vmem:[%s4143_s0 + $0x4] sm:$0x3] }
   0x3   :  { %918 = vst.msk [vmem:[#allocation2 + $0x90] sm:$0xff] %vm911_vm0, %v2529_v0  ;;  %920 = vst.msk [vmem:[#allocation2 + $0x130] sm:$0xff] %vm911_vm0, %v2529_v0  ;;  %v18_v4 = vld [vmem:[%s4143_s0 + $0x6] sm:$0x3]  ;;  %v19_v5 = vld [vmem:[%s4143_s0 + $0x8] sm:$0x3] }
   0x4   :  { %919 = vst.msk [vmem:[#allocation2 + $0x98] sm:$0x3] %vm913_vm1, %v2529_v0  ;;  %921 = vst.msk [vmem:[#allocation2 + $0x138] sm:$0x3] %vm913_vm1, %v2529_v0  ;;  %v20_v6 = vld [vmem:[%s4143_s0 + $0xa] sm:$0x3] }
   0x5   :  { %924 = vst.msk [vmem:[#allocation2 + $0x10] sm:$0x1] %vm922_vm2, %v2529_v0  ;;  %925 = vst.msk [vmem:[#allocation2 + $0x20] sm:$0x1] %vm922_vm2, %v2529_v0  ;;  %v21_v7 = vld [vmem:[%s4143_s0 + $0xc] sm:$0x3] }
   0x6   :  { %926 = vst.msk [vmem:[#allocation2 + $0x30] sm:$0x1] %vm922_vm2, %v2529_v0  ;;  %927 = vst.msk [vmem:[#allocation2 + $0x40] sm:$0x1] %vm922_vm2, %v2529_v0  ;;  %v22_v8 = vld [vmem:[%s4143_s0 + $0xe] sm:$0x3] }
   0x7   :  { %928 = vst.msk [vmem:[#allocation2 + $0x50] sm:$0x1] %vm922_vm2, %v2529_v0  ;;  %929 = vst.msk [vmem:[#allocation2 + $0x60] sm:$0x1] %vm922_vm2, %v2529_v0  ;;  %v23_v9 = vld [vmem:[%s4143_s0 + $0x10] sm:$0x3] }
   0x8   :  { %930 = vst.msk [vmem:[#allocation2 + $0x70] sm:$0x1] %vm922_vm2, %v2529_v0  ;;  %931 = vst.msk [vmem:[#allocation2 + $0x80] sm:$0x1] %vm922_vm2, %v2529_v0  ;;  %v24_v10 = vld [vmem:[%s4143_s0 + $0x12] sm:$0x3]  ;;  %v271_v13 = vmax.f32 %v15_v1, %v23_v9 }
   0x9   :  { %934 = vst.msk [vmem:[#allocation2 + $0xb0] sm:$0x1] %vm922_vm2, %v2529_v0  ;;  %935 = vst.msk [vmem:[#allocation2 + $0xc0] sm:$0x1] %vm922_vm2, %v2529_v0  ;;  %v25_v11 = vld [vmem:[%s4143_s0 + $0x14] sm:$0x3]  ;;  %v272_v17 = vmax.f32 %v16_v2, %v24_v10 }
   0xa   :  { %936 = vst.msk [vmem:[#allocation2 + $0xd0] sm:$0x1] %vm922_vm2, %v2529_v0  ;;  %937 = vst.msk [vmem:[#allocation2 + $0xe0] sm:$0x1] %vm922_vm2, %v2529_v0  ;;  %v26_v12 = vld [vmem:[%s4143_s0 + $0x16] sm:$0x3]  ;;  %v273_v18 = vmax.f32 %v17_v3, %v25_v11 }
   0xb   :  { %938 = vst.msk [vmem:[#allocation2 + $0xf0] sm:$0x1] %vm922_vm2, %v2529_v0  ;;  %939 = vst.msk [vmem:[#allocation2 + $0x100] sm:$0x1] %vm922_vm2, %v2529_v0  ;;  %v27_v14 = vld [vmem:[%s4143_s0 + $0x18] sm:$0x3]  ;;  %v274_v19 = vmax.f32 %v18_v4, %v26_v12 }
   0xc   :  { %940 = vst.msk [vmem:[#allocation2 + $0x110] sm:$0x1] %vm922_vm2, %v2529_v0  ;;  %941 = vst.msk [vmem:[#allocation2 + $0x120] sm:$0x1] %vm922_vm2, %v2529_v0  ;;  %v28_v15 = vld [vmem:[%s4143_s0 + $0x1a] sm:$0x3]  ;;  %v275_v21 = vmax.f32 %v19_v5, %v27_v14 }
   0xd   :  { %944 = vst.msk [vmem:[#allocation2 + $0x19] sm:$0x1] %vm922_vm2, %v2529_v0  ;;  %945 = vst.msk [vmem:[#allocation2 + $0x29] sm:$0x1] %vm922_vm2, %v2529_v0  ;;  %v29_v16 = vld [vmem:[%s4143_s0 + $0x1c] sm:$0x3]  ;;  %v276_v22 = vmax.f32 %v20_v6, %v28_v15 }
   0xe   :  { %946 = vst.msk [vmem:[#allocation2 + $0x39] sm:$0x1] %vm922_vm2, %v2529_v0  ;;  %947 = vst.msk [vmem:[#allocation2 + $0x49] sm:$0x1] %vm922_vm2, %v2529_v0  ;;  %v30_v20 = vld [vmem:[%s4143_s0 + $0x1e] sm:$0x3]  ;;  %v277_v23 = vmax.f32 %v21_v7, %v29_v16 }
   0xf   :  { %948 = vst.msk [vmem:[#allocation2 + $0x59] sm:$0x1] %vm922_vm2, %v2529_v0  ;;  %949 = vst.msk [vmem:[#allocation2 + $0x69] sm:$0x1] %vm922_vm2, %v2529_v0  ;;  %v527_v24 = vrot.slane %v271_v13, 1  ;;  %v278_v25 = vmax.f32 %v22_v8, %v30_v20  ;;  %v528_v26 = vrot.slane %v272_v17, 1 }
  0x10   :  { %950 = vst.msk [vmem:[#allocation2 + $0x79] sm:$0x1] %vm922_vm2, %v2529_v0  ;;  %951 = vst.msk [vmem:[#allocation2 + $0x89] sm:$0x1] %vm922_vm2, %v2529_v0  ;;  %v529_v27 = vrot.slane %v273_v18, 1  ;;  %v530_v28 = vrot.slane %v274_v19, 1 }
  0x11   :  { %954 = vst.msk [vmem:[#allocation2 + $0xb9] sm:$0x1] %vm922_vm2, %v2529_v0  ;;  %955 = vst.msk [vmem:[#allocation2 + $0xc9] sm:$0x1] %vm922_vm2, %v2529_v0  ;;  %v1371_v29 = vld [vmem:[#allocation2 + $0x1] sm:$0xff]  ;;  %v531_v30 = vrot.slane %v275_v21, 1  ;;  %v783_v33 = vmax.f32 %v271_v13, %v527_v24  ;;  %v784_v36 = vmax.f32 %v272_v17, %v528_v26 }
  0x12   :  { %956 = vst.msk [vmem:[#allocation2 + $0xd9] sm:$0x1] %vm922_vm2, %v2529_v0  ;;  %957 = vst.msk [vmem:[#allocation2 + $0xe9] sm:$0x1] %vm922_vm2, %v2529_v0  ;;  %v532_v31 = vrot.slane %v276_v22, 1  ;;  %v533_v32 = vrot.slane %v277_v23, 1  ;;  %1516 = vrot.lane.b32.xlu0 %v1371_v29, %s2530_s17  ;;  %v785_v37 = vmax.f32 %v273_v18, %v529_v27  ;;  %v786_v38 = vmax.f32 %v274_v19, %v530_v28 }
  0x13   :  { %958 = vst.msk [vmem:[#allocation2 + $0xf9] sm:$0x1] %vm922_vm2, %v2529_v0  ;;  %959 = vst.msk [vmem:[#allocation2 + $0x109] sm:$0x1] %vm922_vm2, %v2529_v0  ;;  %v534_v35 = vrot.slane %v278_v25, 1  ;;  %v1379_v39 = vld [vmem:[#allocation2 + $0xa1] sm:$0xff]  ;;  %v787_v40 = vmax.f32 %v275_v21, %v531_v30 }
  0x14   :  { %960 = vst.msk [vmem:[#allocation2 + $0x119] sm:$0x1] %vm922_vm2, %v2529_v0  ;;  %961 = vst.msk [vmem:[#allocation2 + $0x129] sm:$0x1] %vm922_vm2, %v2529_v0  ;;  %v788_v41 = vmax.f32 %v276_v22, %v532_v31  ;;  %v789_v42 = vmax.f32 %v277_v23, %v533_v32  ;;  %vm1092_vm3 = vcmask 1041409   ;;  %v1091_v45 = vrot.slane %v784_v36, 7 }
  0x15   :  { %953 = vst.msk [vmem:[#allocation2 + $0xa9] sm:$0x1] %vm922_vm2, %v2529_v0  ;;  %923 = vst.msk [vmem:[#allocation2] sm:$0x1] %vm922_vm2, %v2529_v0  ;;  %v143_v43 = vld [vmem:[%s4143_s0 + $0x100] sm:$0x3]  ;;  %v790_v44 = vmax.f32 %v278_v25, %v534_v35 }
  0x16   :  { %932 = vst.msk [vmem:[#allocation2 + $0x90] sm:$0x1] %vm922_vm2, %v2529_v0  ;;  %933 = vst.msk [vmem:[#allocation2 + $0xa0] sm:$0x1] %vm922_vm2, %v2529_v0  ;;  %v1094_v46 = vrot.slane %v785_v37, 6  ;;  %vm1095_vm4 = vcmask 1042434   ;;  %1532 = vrot.lane.b32.xlu0 %v1379_v39, %s2530_s17  ;;  %v1093_v55 = vsel %vm1092_vm3, %v1091_v45, %v783_v33 }
  0x17   :  { %942 = vst.msk [vmem:[#allocation2 + $0x130] sm:$0x1] %vm922_vm2, %v2529_v0  ;;  %943 = vst.msk [vmem:[#allocation2 + $0x9] sm:$0x1] %vm922_vm2, %v2529_v0  ;;  %v144_v47 = vld [vmem:[%s4143_s0 + $0x102] sm:$0x3] }
  0x18   :  { %952 = vst.msk [vmem:[#allocation2 + $0x99] sm:$0x1] %vm922_vm2, %v2529_v0  ;;  %962 = vst.msk [vmem:[#allocation2 + $0x139] sm:$0x1] %vm922_vm2, %v2529_v0  ;;  %v145_v48 = vld [vmem:[%s4143_s0 + $0x104] sm:$0x3]  ;;  %v1096_v60 = vsel %vm1095_vm4, %v1094_v46, %v1093_v55 }
  0x19   :  { %v146_v49 = vld [vmem:[%s4143_s0 + $0x106] sm:$0x3]  ;;  %v1097_v50 = vrot.slane %v786_v38, 5  ;;  %vm1098_vm5 = vcmask 1043459   ;;  %v1100_v51 = vrot.slane %v787_v40, 4  ;;  %vm1101_vm6 = vcmask 1044484  }
  0x1a   :  { %v147_v52 = vld [vmem:[%s4143_s0 + $0x108] sm:$0x3]  ;;  %v148_v53 = vld [vmem:[%s4143_s0 + $0x10a] sm:$0x3]  ;;  %v149_v54 = vld [vmem:[%s4143_s0 + $0x10c] sm:$0x3] }
  0x1b   :  { %v1103_v56 = vrot.slane %v788_v41, 3  ;;  %vm1104_vm7 = vcmask 1045509   ;;  %v1106_v57 = vrot.slane %v789_v42, 2  ;;  %v150_v58 = vld [vmem:[%s4143_s0 + $0x10e] sm:$0x3]  ;;  %vm1107_vm8 = vcmask 1046534  }
  0x1c   :  { %v1395_v34 = vld [vmem:[#allocation2 + $0xa2] sm:$0xff]  ;;  %v1109_v61 = vrot.slane %v790_v44, 1  ;;  %vm1110_vm9 = vcmask 1047559   ;;  %v151_v62 = vld [vmem:[%s4143_s0 + $0x110] sm:$0x3]  ;;  %v1099_v63 = vsel %vm1098_vm5, %v1097_v50, %v1096_v60  ;;  %s2532_s7 = smov 12  }
  0x1d   :  { %1596 = vrot.lane.b32.xlu1 %v1395_v34, %s2531_s18  ;;  %v152_v0 = vld [vmem:[%s4143_s0 + $0x112] sm:$0x3]  ;;  %v153_v1 = vld [vmem:[%s4143_s0 + $0x114] sm:$0x3]  ;;  %v154_v2 = vld [vmem:[%s4143_s0 + $0x116] sm:$0x3]  ;;  %v335_v3 = vmax.f32 %v143_v43, %v151_v62  ;;  %v1102_v4 = vsel %vm1101_vm6, %v1100_v51, %v1099_v63 }
  0x1e   :  { %v1387_v59 = vld [vmem:[#allocation2 + $0x2] sm:$0xff]  ;;  %v155_v5 = vld [vmem:[%s4143_s0 + $0x118] sm:$0x3]  ;;  %v156_v6 = vld [vmem:[%s4143_s0 + $0x11a] sm:$0x3]  ;;  %v336_v8 = vmax.f32 %v144_v47, %v152_v0  ;;  %v337_v9 = vmax.f32 %v145_v48, %v153_v1  ;;  %v338_v10 = vmax.f32 %v146_v49, %v154_v2  ;;  %v1105_v11 = vsel %vm1104_vm7, %v1103_v56, %v1102_v4  ;;  %s2533_s5 = smov 16  }
  0x1f   :  { %v157_v7 = vld [vmem:[%s4143_s0 + $0x11c] sm:$0x3]  ;;  %1580 = vrot.lane.b32.xlu0 %v1387_v59, %s2531_s18  ;;  %v158_v12 = vld [vmem:[%s4143_s0 + $0x11e] sm:$0x3]  ;;  %v339_v13 = vmax.f32 %v147_v52, %v155_v5  ;;  %v340_v14 = vmax.f32 %v148_v53, %v156_v6  ;;  %v1108_v16 = vsel %vm1107_vm8, %v1106_v57, %v1105_v11  ;;  %v591_v18 = vrot.slane %v335_v3, 1  ;;  %s2534_s16 = smov 20  }
  0x20   :  { %v341_v15 = vmax.f32 %v149_v54, %v157_v7  ;;  %v342_v17 = vmax.f32 %v150_v58, %v158_v12  ;;  %v592_v19 = vrot.slane %v336_v8, 1  ;;  %v31_v20 = vld [vmem:[%s4143_s0 + $0x20] sm:$0x3]  ;;  %v1111_v21 = vsel %vm1110_vm9, %v1109_v61, %v1108_v16  ;;  %v32_v25 = vld [vmem:[%s4143_s0 + $0x22] sm:$0x3]  ;;  %s2535_s12 = smov 24  }
  0x21   :  { %v593_v22 = vrot.slane %v337_v9, 1  ;;  %v594_v23 = vrot.slane %v338_v10, 1  ;;  %v595_v24 = vrot.slane %v339_v13, 1  ;;  %1339 = vst.msk [vmem:[#allocation2 + $0x11] sm:$0xff] %vm911_vm0, %v1111_v21  ;;  %v596_v26 = vrot.slane %v340_v14, 1  ;;  %s2536_s8 = smov 28  }
  0x22   :  { %v597_v27 = vrot.slane %v341_v15, 1  ;;  %v598_v28 = vrot.slane %v342_v17, 1  ;;  %v847_v29 = vmax.f32 %v335_v3, %v591_v18  ;;  %v33_v30 = vld [vmem:[%s4143_s0 + $0x24] sm:$0x3]  ;;  %v34_v31 = vld [vmem:[%s4143_s0 + $0x26] sm:$0x3]  ;;  %v848_v33 = vmax.f32 %v336_v8, %v592_v19 }
  0x23   :  { %v35_v32 = vld [vmem:[%s4143_s0 + $0x28] sm:$0x3]  ;;  %v849_v34 = vmax.f32 %v337_v9, %v593_v22  ;;  %v850_v35 = vmax.f32 %v338_v10, %v594_v23  ;;  %v851_v36 = vmax.f32 %v339_v13, %v595_v24  ;;  %v36_v37 = vld [vmem:[%s4143_s0 + $0x2a] sm:$0x3]  ;;  %v37_v38 = vld [vmem:[%s4143_s0 + $0x2c] sm:$0x3]  ;;  %v852_v41 = vmax.f32 %v340_v14, %v596_v26 }
  0x24   :  { %v38_v39 = vld [vmem:[%s4143_s0 + $0x2e] sm:$0x3]  ;;  %v39_v40 = vld [vmem:[%s4143_s0 + $0x30] sm:$0x3]  ;;  %v853_v42 = vmax.f32 %v341_v15, %v597_v27  ;;  %v854_v43 = vmax.f32 %v342_v17, %v598_v28  ;;  %v40_v44 = vld [vmem:[%s4143_s0 + $0x32] sm:$0x3] }
  0x25   :  { %v41_v45 = vld [vmem:[%s4143_s0 + $0x34] sm:$0x3]  ;;  %v42_v46 = vld [vmem:[%s4143_s0 + $0x36] sm:$0x3]  ;;  %v279_v47 = vmax.f32 %v31_v20, %v39_v40  ;;  %v1210_v48 = vrot.slane %v848_v33, 7  ;;  %v1212_v49 = vrot.slane %v849_v34, 6  ;;  %v280_v57 = vmax.f32 %v32_v25, %v40_v44 }
  0x26   :  { %v1214_v50 = vrot.slane %v850_v35, 5  ;;  %v1216_v51 = vrot.slane %v851_v36, 4  ;;  %v43_v52 = vld [vmem:[%s4143_s0 + $0x38] sm:$0x3]  ;;  %v1218_v53 = vrot.slane %v852_v41, 3  ;;  %v1220_v54 = vrot.slane %v853_v42, 2 }
  0x27   :  { %v1222_v55 = vrot.slane %v854_v43, 1  ;;  %v44_v56 = vld [vmem:[%s4143_s0 + $0x3a] sm:$0x3]  ;;  %v1211_v58 = vsel %vm1092_vm3, %v1210_v48, %v847_v29  ;;  %v45_v59 = vld [vmem:[%s4143_s0 + $0x3c] sm:$0x3]  ;;  %v281_v61 = vmax.f32 %v33_v30, %v41_v45  ;;  %v282_v62 = vmax.f32 %v34_v31, %v42_v46  ;;  %s2537_s9 = smov 32  }
  0x28   :  { %v46_v60 = vld [vmem:[%s4143_s0 + $0x3e] sm:$0x3]  ;;  %v283_v63 = vmax.f32 %v35_v32, %v43_v52  ;;  %v1213_v0 = vsel %vm1095_vm4, %v1212_v49, %v1211_v58  ;;  %v284_v1 = vmax.f32 %v36_v37, %v44_v56  ;;  %v285_v2 = vmax.f32 %v37_v38, %v45_v59  ;;  %v2762_v4 = vld [vmem:[#allocation2 + $0x12] sm:$0xff]  ;;  %v159_v14 = vld [vmem:[%s4143_s0 + $0x120] sm:$0x3] }
  0x29   :  { %v286_v3 = vmax.f32 %v38_v39, %v46_v60  ;;  %v2764_v5 = vld [vmem:[#allocation2 + $0x11] sm:$0xff]  ;;  %v1215_v6 = vsel %vm1098_vm5, %v1214_v50, %v1213_v0  ;;  %v535_v7 = vrot.slane %v279_v47, 1  ;;  %v536_v8 = vrot.slane %v280_v57, 1  ;;  %1582 = vrot.lane.b32.xlu0 %v2762_v4, %s2531_s18  ;;  %v160_v20 = vld [vmem:[%s4143_s0 + $0x122] sm:$0x3] }
  0x2a   :  { %v537_v9 = vrot.slane %v281_v61, 1  ;;  %1518 = vrot.lane.b32.xlu1 %v2764_v5, %s2530_s17  ;;  %v1217_v10 = vsel %vm1101_vm6, %v1216_v51, %v1215_v6  ;;  %v538_v11 = vrot.slane %v282_v62, 1  ;;  %v539_v12 = vrot.slane %v283_v63, 1  ;;  %v1403_v15 = vld [vmem:[#allocation2 + $0x10] sm:$0xff]  ;;  %v161_v21 = vld [vmem:[%s4143_s0 + $0x124] sm:$0x3] }
  0x2b   :  { %v540_v13 = vrot.slane %v284_v1, 1  ;;  %v1219_v16 = vsel %vm1104_vm7, %v1218_v53, %v1217_v10  ;;  %v541_v17 = vrot.slane %v285_v2, 1  ;;  %v542_v18 = vrot.slane %v286_v3, 1  ;;  %v162_v26 = vld [vmem:[%s4143_s0 + $0x126] sm:$0x3] }
  0x2c   :  { %v791_v19 = vmax.f32 %v279_v47, %v535_v7  ;;  %v1221_v22 = vsel %vm1107_vm8, %v1220_v54, %v1219_v16  ;;  %v792_v23 = vmax.f32 %v280_v57, %v536_v8  ;;  %v793_v24 = vmax.f32 %v281_v61, %v537_v9  ;;  %v163_v27 = vld [vmem:[%s4143_s0 + $0x128] sm:$0x3]  ;;  %v164_v28 = vld [vmem:[%s4143_s0 + $0x12a] sm:$0x3]  ;;  %v167_v29 = vld [vmem:[%s4143_s0 + $0x130] sm:$0x3] }
  0x2d   :  { %v794_v25 = vmax.f32 %v282_v62, %v538_v11  ;;  %v168_v30 = vld [vmem:[%s4143_s0 + $0x132] sm:$0x3]  ;;  %v1223_v31 = vsel %vm1110_vm9, %v1222_v55, %v1221_v22  ;;  %v795_v32 = vmax.f32 %v283_v63, %v539_v12  ;;  %v796_v33 = vmax.f32 %v284_v1, %v540_v13  ;;  %v165_v35 = vld [vmem:[%s4143_s0 + $0x12c] sm:$0x3]  ;;  %v166_v36 = vld [vmem:[%s4143_s0 + $0x12e] sm:$0x3]  ;;  %1644 = vrot.lane.b32.xlu0 %v1403_v15, %s2532_s7 }
  0x2e   :  { %v797_v34 = vmax.f32 %v285_v2, %v541_v17  ;;  %v169_v37 = vld [vmem:[%s4143_s0 + $0x134] sm:$0x3]  ;;  %v170_v38 = vld [vmem:[%s4143_s0 + $0x136] sm:$0x3]  ;;  %v171_v39 = vld [vmem:[%s4143_s0 + $0x138] sm:$0x3]  ;;  %v798_v40 = vmax.f32 %v286_v3, %v542_v18  ;;  %v343_v49 = vmax.f32 %v159_v14, %v167_v29  ;;  %v344_v53 = vmax.f32 %v160_v20, %v168_v30 }
  0x2f   :  { %1347 = vst.msk [vmem:[#allocation2 + $0xb1] sm:$0xff] %vm911_vm0, %v1223_v31  ;;  %v1112_v41 = vrot.slane %v792_v23, 7  ;;  %v1114_v42 = vrot.slane %v793_v24, 6  ;;  %v1116_v43 = vrot.slane %v794_v25, 5  ;;  %v172_v44 = vld [vmem:[%s4143_s0 + $0x13a] sm:$0x3]  ;;  %v345_v54 = vmax.f32 %v161_v21, %v169_v37 }
  0x30   :  { %v1118_v45 = vrot.slane %v795_v32, 4  ;;  %v1120_v46 = vrot.slane %v796_v33, 3  ;;  %v1122_v47 = vrot.slane %v797_v34, 2  ;;  %v173_v48 = vld [vmem:[%s4143_s0 + $0x13c] sm:$0x3]  ;;  %v1124_v51 = vrot.slane %v798_v40, 1 }
  0x31   :  { %v1113_v50 = vsel %vm1092_vm3, %v1112_v41, %v791_v19  ;;  %v174_v52 = vld [vmem:[%s4143_s0 + $0x13e] sm:$0x3]  ;;  %v346_v56 = vmax.f32 %v162_v26, %v170_v38  ;;  %v347_v57 = vmax.f32 %v163_v27, %v171_v39  ;;  %v348_v58 = vmax.f32 %v164_v28, %v172_v44  ;;  %v47_v9 = vld [vmem:[%s4143_s0 + $0x40] sm:$0x3]  ;;  %v48_v15 = vld [vmem:[%s4143_s0 + $0x42] sm:$0x3] }
  0x32   :  { %v1115_v55 = vsel %vm1095_vm4, %v1114_v42, %v1113_v50  ;;  %v349_v60 = vmax.f32 %v165_v35, %v173_v48  ;;  %v350_v61 = vmax.f32 %v166_v36, %v174_v52  ;;  %v599_v62 = vrot.slane %v343_v49, 1  ;;  %v49_v16 = vld [vmem:[%s4143_s0 + $0x44] sm:$0x3]  ;;  %v50_v17 = vld [vmem:[%s4143_s0 + $0x46] sm:$0x3] }
  0x33   :  { %v1117_v59 = vsel %vm1098_vm5, %v1116_v43, %v1115_v55  ;;  %v600_v0 = vrot.slane %v344_v53, 1  ;;  %v601_v1 = vrot.slane %v345_v54, 1  ;;  %v602_v2 = vrot.slane %v346_v56, 1  ;;  %v51_v22 = vld [vmem:[%s4143_s0 + $0x48] sm:$0x3] }
  0x34   :  { %v1119_v63 = vsel %vm1101_vm6, %v1118_v45, %v1117_v59  ;;  %v603_v6 = vrot.slane %v347_v57, 1  ;;  %v604_v7 = vrot.slane %v348_v58, 1  ;;  %v605_v8 = vrot.slane %v349_v60, 1  ;;  %v52_v23 = vld [vmem:[%s4143_s0 + $0x4a] sm:$0x3] }
  0x35   :  { %v1121_v3 = vsel %vm1104_vm7, %v1120_v46, %v1119_v63  ;;  %v606_v12 = vrot.slane %v350_v61, 1  ;;  %v855_v13 = vmax.f32 %v343_v49, %v599_v62  ;;  %v856_v14 = vmax.f32 %v344_v53, %v600_v0  ;;  %v53_v24 = vld [vmem:[%s4143_s0 + $0x4c] sm:$0x3]  ;;  %v55_v25 = vld [vmem:[%s4143_s0 + $0x50] sm:$0x3] }
  0x36   :  { %v2833_v10 = vld [vmem:[#allocation2 + $0xb1] sm:$0xff]  ;;  %v1123_v11 = vsel %vm1107_vm8, %v1122_v47, %v1121_v3  ;;  %v857_v19 = vmax.f32 %v345_v54, %v601_v1  ;;  %v858_v20 = vmax.f32 %v346_v56, %v602_v2  ;;  %v859_v21 = vmax.f32 %v347_v57, %v603_v6  ;;  %v54_v33 = vld [vmem:[%s4143_s0 + $0x4e] sm:$0x3]  ;;  %v60_v39 = vld [vmem:[%s4143_s0 + $0x5a] sm:$0x3] }
  0x37   :  { %1534 = vrot.lane.b32.xlu1 %v2833_v10, %s2530_s17  ;;  %v1125_v18 = vsel %vm1110_vm9, %v1124_v51, %v1123_v11  ;;  %v56_v26 = vld [vmem:[%s4143_s0 + $0x52] sm:$0x3]  ;;  %v57_v27 = vld [vmem:[%s4143_s0 + $0x54] sm:$0x3]  ;;  %v860_v29 = vmax.f32 %v348_v58, %v604_v7  ;;  %v861_v30 = vmax.f32 %v349_v60, %v605_v8  ;;  %v862_v31 = vmax.f32 %v350_v61, %v606_v12  ;;  %v58_v34 = vld [vmem:[%s4143_s0 + $0x56] sm:$0x3] }
  0x38   :  { %1340 = vst.msk [vmem:[#allocation2 + $0x21] sm:$0xff] %vm911_vm0, %v1125_v18  ;;  %v2867_v28 = vld [vmem:[#allocation2 + $0xb2] sm:$0xff]  ;;  %v1224_v32 = vrot.slane %v856_v14, 7  ;;  %v1226_v36 = vrot.slane %v857_v19, 6  ;;  %v1228_v37 = vrot.slane %v858_v20, 5  ;;  %v1230_v38 = vrot.slane %v859_v21, 4 }
  0x39   :  { %v59_v35 = vld [vmem:[%s4143_s0 + $0x58] sm:$0x3]  ;;  %v287_v40 = vmax.f32 %v47_v9, %v55_v25  ;;  %v1232_v42 = vrot.slane %v860_v29, 3  ;;  %v1234_v43 = vrot.slane %v861_v30, 2  ;;  %v1236_v44 = vrot.slane %v862_v31, 1  ;;  %v1411_v51 = vld [vmem:[#allocation2 + $0xb0] sm:$0xff] }
  0x3a   :  { %v1225_v41 = vsel %vm1092_vm3, %v1224_v32, %v855_v13  ;;  %v61_v45 = vld [vmem:[%s4143_s0 + $0x5c] sm:$0x3]  ;;  %v62_v47 = vld [vmem:[%s4143_s0 + $0x5e] sm:$0x3]  ;;  %v288_v48 = vmax.f32 %v48_v15, %v56_v26  ;;  %v289_v49 = vmax.f32 %v49_v16, %v57_v27  ;;  %v290_v50 = vmax.f32 %v50_v17, %v58_v34  ;;  %v175_v0 = vld [vmem:[%s4143_s0 + $0x140] sm:$0x3] }
  0x3b   :  { %1598 = vrot.lane.b32.xlu1 %v2867_v28, %s2531_s18  ;;  %v1227_v46 = vsel %vm1095_vm4, %v1226_v36, %v1225_v41  ;;  %v291_v53 = vmax.f32 %v51_v22, %v59_v35  ;;  %v292_v54 = vmax.f32 %v52_v23, %v60_v39  ;;  %v293_v55 = vmax.f32 %v53_v24, %v61_v45  ;;  %v176_v8 = vld [vmem:[%s4143_s0 + $0x142] sm:$0x3]  ;;  %v177_v9 = vld [vmem:[%s4143_s0 + $0x144] sm:$0x3]  ;;  %v178_v15 = vld [vmem:[%s4143_s0 + $0x146] sm:$0x3] }
  0x3c   :  { %v1229_v52 = vsel %vm1098_vm5, %v1228_v37, %v1227_v46  ;;  %v294_v57 = vmax.f32 %v54_v33, %v62_v47  ;;  %v543_v58 = vrot.slane %v287_v40, 1  ;;  %v544_v59 = vrot.slane %v288_v48, 1  ;;  %v179_v16 = vld [vmem:[%s4143_s0 + $0x148] sm:$0x3]  ;;  %v180_v17 = vld [vmem:[%s4143_s0 + $0x14a] sm:$0x3] }
  0x3d   :  { %v1231_v56 = vsel %vm1101_vm6, %v1230_v38, %v1229_v52  ;;  %v545_v61 = vrot.slane %v289_v49, 1  ;;  %v546_v62 = vrot.slane %v290_v50, 1  ;;  %v547_v63 = vrot.slane %v291_v53, 1  ;;  %v183_v18 = vld [vmem:[%s4143_s0 + $0x150] sm:$0x3] }
  0x3e   :  { %v1233_v60 = vsel %vm1104_vm7, %v1232_v42, %v1231_v56  ;;  %v548_v3 = vrot.slane %v292_v54, 1  ;;  %v549_v6 = vrot.slane %v293_v55, 1  ;;  %v550_v7 = vrot.slane %v294_v57, 1  ;;  %v184_v19 = vld [vmem:[%s4143_s0 + $0x152] sm:$0x3] }
  0x3f   :  { %v2897_v1 = vld [vmem:[#allocation2 + $0x20] sm:$0xff]  ;;  %1660 = vrot.lane.b32.xlu1 %v1411_v51, %s2532_s7  ;;  %v1235_v2 = vsel %vm1107_vm8, %v1234_v43, %v1233_v60  ;;  %v799_v12 = vmax.f32 %v287_v40, %v543_v58  ;;  %v800_v13 = vmax.f32 %v288_v48, %v544_v59  ;;  %v801_v14 = vmax.f32 %v289_v49, %v545_v61  ;;  %v181_v24 = vld [vmem:[%s4143_s0 + $0x14c] sm:$0x3]  ;;  %v182_v25 = vld [vmem:[%s4143_s0 + $0x14e] sm:$0x3] }
  0x40   :  { %1646 = vrot.lane.b32.xlu0 %v2897_v1, %s2532_s7  ;;  %v1237_v11 = vsel %vm1110_vm9, %v1236_v44, %v1235_v2  ;;  %v802_v20 = vmax.f32 %v290_v50, %v546_v62  ;;  %v803_v21 = vmax.f32 %v291_v53, %v547_v63  ;;  %v804_v22 = vmax.f32 %v292_v54, %v548_v3  ;;  %v185_v26 = vld [vmem:[%s4143_s0 + $0x154] sm:$0x3]  ;;  %v186_v27 = vld [vmem:[%s4143_s0 + $0x156] sm:$0x3]  ;;  %v187_v29 = vld [vmem:[%s4143_s0 + $0x158] sm:$0x3] }
  0x41   :  { %1348 = vst.msk [vmem:[#allocation2 + $0xc1] sm:$0xff] %vm911_vm0, %v1237_v11  ;;  %v805_v23 = vmax.f32 %v293_v55, %v549_v6  ;;  %v806_v30 = vmax.f32 %v294_v57, %v550_v7  ;;  %v1126_v31 = vrot.slane %v800_v13, 7  ;;  %v1128_v32 = vrot.slane %v801_v14, 6  ;;  %v188_v33 = vld [vmem:[%s4143_s0 + $0x15a] sm:$0x3]  ;;  %v2953_v45 = vld [vmem:[#allocation2 + $0x21] sm:$0xff] }
  0x42   :  { %v189_v34 = vld [vmem:[%s4143_s0 + $0x15c] sm:$0x3]  ;;  %v351_v35 = vmax.f32 %v175_v0, %v183_v18  ;;  %v1130_v36 = vrot.slane %v802_v20, 5  ;;  %v1132_v37 = vrot.slane %v803_v21, 4  ;;  %v1134_v38 = vrot.slane %v804_v22, 3 }
  0x43   :  { %v1136_v39 = vrot.slane %v805_v23, 2  ;;  %v190_v40 = vld [vmem:[%s4143_s0 + $0x15e] sm:$0x3]  ;;  %v1127_v41 = vsel %vm1092_vm3, %v1126_v31, %v799_v12  ;;  %v1138_v42 = vrot.slane %v806_v30, 1  ;;  %v352_v43 = vmax.f32 %v176_v8, %v184_v19  ;;  %v63_v62 = vld [vmem:[%s4143_s0 + $0x60] sm:$0x3] }
  0x44   :  { %1708 = vrot.lane.b32.xlu0 %v2764_v5, %s2533_s5  ;;  %v353_v44 = vmax.f32 %v177_v9, %v185_v26  ;;  %v1129_v46 = vsel %vm1095_vm4, %v1128_v32, %v1127_v41  ;;  %v354_v47 = vmax.f32 %v178_v15, %v186_v27  ;;  %v355_v48 = vmax.f32 %v179_v16, %v187_v29  ;;  %v64_v6 = vld [vmem:[%s4143_s0 + $0x62] sm:$0x3]  ;;  %v65_v7 = vld [vmem:[%s4143_s0 + $0x64] sm:$0x3]  ;;  %v66_v8 = vld [vmem:[%s4143_s0 + $0x66] sm:$0x3] }
  0x45   :  { %v356_v49 = vmax.f32 %v180_v17, %v188_v33  ;;  %v1131_v50 = vsel %vm1098_vm5, %v1130_v36, %v1129_v46  ;;  %v357_v51 = vmax.f32 %v181_v24, %v189_v34  ;;  %v358_v52 = vmax.f32 %v182_v25, %v190_v40  ;;  %v71_v9 = vld [vmem:[%s4143_s0 + $0x70] sm:$0x3]  ;;  %v67_v15 = vld [vmem:[%s4143_s0 + $0x68] sm:$0x3]  ;;  %v68_v16 = vld [vmem:[%s4143_s0 + $0x6a] sm:$0x3] }
  0x46   :  { %v607_v53 = vrot.slane %v351_v35, 1  ;;  %v1133_v54 = vsel %vm1101_vm6, %v1132_v37, %v1131_v50  ;;  %v608_v5 = vrot.slane %v352_v43, 1  ;;  %v609_v55 = vrot.slane %v353_v44, 1  ;;  %v69_v17 = vld [vmem:[%s4143_s0 + $0x6c] sm:$0x3] }
  0x47   :  { %v610_v56 = vrot.slane %v354_v47, 1  ;;  %v1135_v58 = vsel %vm1104_vm7, %v1134_v38, %v1133_v54  ;;  %v611_v59 = vrot.slane %v355_v48, 1  ;;  %v612_v60 = vrot.slane %v356_v49, 1  ;;  %v72_v18 = vld [vmem:[%s4143_s0 + $0x72] sm:$0x3] }
  0x48   :  { %1520 = vrot.lane.b32.xlu0 %v2953_v45, %s2530_s17  ;;  %v2960_v57 = vld [vmem:[#allocation2 + $0xc0] sm:$0xff]  ;;  %v613_v61 = vrot.slane %v357_v51, 1  ;;  %v1137_v63 = vsel %vm1107_vm8, %v1136_v39, %v1135_v58  ;;  %v614_v0 = vrot.slane %v358_v52, 1  ;;  %v863_v2 = vmax.f32 %v351_v35, %v607_v53  ;;  %v73_v19 = vld [vmem:[%s4143_s0 + $0x74] sm:$0x3] }
  0x49   :  { %1662 = vrot.lane.b32.xlu1 %v2960_v57, %s2532_s7  ;;  %v864_v3 = vmax.f32 %v352_v43, %v608_v5  ;;  %v1139_v11 = vsel %vm1110_vm9, %v1138_v42, %v1137_v63  ;;  %v865_v12 = vmax.f32 %v353_v44, %v609_v55  ;;  %v866_v13 = vmax.f32 %v354_v47, %v610_v56  ;;  %v74_v20 = vld [vmem:[%s4143_s0 + $0x76] sm:$0x3]  ;;  %v70_v25 = vld [vmem:[%s4143_s0 + $0x6e] sm:$0x3]  ;;  %v75_v26 = vld [vmem:[%s4143_s0 + $0x78] sm:$0x3] }
  0x4a   :  { %v867_v14 = vmax.f32 %v355_v48, %v611_v59  ;;  %1341 = vst.msk [vmem:[#allocation2 + $0x31] sm:$0xff] %vm911_vm0, %v1139_v11  ;;  %v868_v21 = vmax.f32 %v356_v49, %v612_v60  ;;  %v869_v22 = vmax.f32 %v357_v51, %v613_v61  ;;  %v870_v23 = vmax.f32 %v358_v52, %v614_v0  ;;  %v76_v27 = vld [vmem:[%s4143_s0 + $0x7a] sm:$0x3]  ;;  %v77_v32 = vld [vmem:[%s4143_s0 + $0x7c] sm:$0x3]  ;;  %v3021_v39 = vld [vmem:[#allocation2 + $0xc1] sm:$0xff] }
  0x4b   :  { %v1238_v24 = vrot.slane %v864_v3, 7  ;;  %v1240_v29 = vrot.slane %v865_v12, 6  ;;  %v1242_v30 = vrot.slane %v866_v13, 5  ;;  %v295_v33 = vmax.f32 %v63_v62, %v71_v9  ;;  %v78_v38 = vld [vmem:[%s4143_s0 + $0x7e] sm:$0x3]  ;;  %v3046_v0 = vld [vmem:[#allocation2 + $0x22] sm:$0xff] }
  0x4c   :  { %1710 = vrot.lane.b32.xlu0 %v2953_v45, %s2533_s5  ;;  %v1244_v31 = vrot.slane %v867_v14, 4  ;;  %v1246_v35 = vrot.slane %v868_v21, 3  ;;  %v1248_v36 = vrot.slane %v869_v22, 2  ;;  %v1250_v37 = vrot.slane %v870_v23, 1  ;;  %v191_v55 = vld [vmem:[%s4143_s0 + $0x160] sm:$0x3] }
  0x4d   :  { %1724 = vrot.lane.b32.xlu1 %v2833_v10, %s2533_s5  ;;  %v1239_v34 = vsel %vm1092_vm3, %v1238_v24, %v863_v2  ;;  %v296_v41 = vmax.f32 %v64_v6, %v72_v18  ;;  %v297_v42 = vmax.f32 %v65_v7, %v73_v19  ;;  %v298_v43 = vmax.f32 %v66_v8, %v74_v20  ;;  %v192_v61 = vld [vmem:[%s4143_s0 + $0x162] sm:$0x3]  ;;  %v193_v62 = vld [vmem:[%s4143_s0 + $0x164] sm:$0x3]  ;;  %v199_v63 = vld [vmem:[%s4143_s0 + $0x170] sm:$0x3] }
  0x4e   :  { %v1241_v40 = vsel %vm1095_vm4, %v1240_v29, %v1239_v34  ;;  %v299_v46 = vmax.f32 %v67_v15, %v75_v26  ;;  %v300_v10 = vmax.f32 %v68_v16, %v76_v27  ;;  %v301_v47 = vmax.f32 %v69_v17, %v77_v32  ;;  %v194_v8 = vld [vmem:[%s4143_s0 + $0x166] sm:$0x3]  ;;  %v195_v9 = vld [vmem:[%s4143_s0 + $0x168] sm:$0x3]  ;;  %v196_v11 = vld [vmem:[%s4143_s0 + $0x16a] sm:$0x3] }
  0x4f   :  { %v1243_v44 = vsel %vm1098_vm5, %v1242_v30, %v1241_v40  ;;  %v302_v49 = vmax.f32 %v70_v25, %v78_v38  ;;  %v551_v50 = vrot.slane %v295_v33, 1  ;;  %v552_v51 = vrot.slane %v296_v41, 1  ;;  %v200_v12 = vld [vmem:[%s4143_s0 + $0x172] sm:$0x3]  ;;  %v197_v17 = vld [vmem:[%s4143_s0 + $0x16c] sm:$0x3] }
  0x50   :  { %1772 = vrot.lane.b32.xlu0 %v2762_v4, %s2534_s16  ;;  %v1245_v48 = vsel %vm1101_vm6, %v1244_v31, %v1243_v44  ;;  %v553_v53 = vrot.slane %v297_v42, 1  ;;  %v554_v54 = vrot.slane %v298_v43, 1  ;;  %v555_v5 = vrot.slane %v299_v46, 1  ;;  %v198_v18 = vld [vmem:[%s4143_s0 + $0x16e] sm:$0x3] }
  0x51   :  { %1536 = vrot.lane.b32.xlu1 %v3021_v39, %s2530_s17  ;;  %v1247_v52 = vsel %vm1104_vm7, %v1246_v35, %v1245_v48  ;;  %v3034_v56 = vld [vmem:[#allocation2 + $0x31] sm:$0xff]  ;;  %v556_v58 = vrot.slane %v300_v10, 1  ;;  %v557_v59 = vrot.slane %v301_v47, 1  ;;  %v558_v60 = vrot.slane %v302_v49, 1  ;;  %v204_v25 = vld [vmem:[%s4143_s0 + $0x17a] sm:$0x3] }
  0x52   :  { %v1249_v4 = vsel %vm1107_vm8, %v1248_v36, %v1247_v52  ;;  %v807_v3 = vmax.f32 %v295_v33, %v551_v50  ;;  %v808_v6 = vmax.f32 %v296_v41, %v552_v51  ;;  %v809_v7 = vmax.f32 %v297_v42, %v553_v53  ;;  %v201_v19 = vld [vmem:[%s4143_s0 + $0x174] sm:$0x3]  ;;  %v202_v20 = vld [vmem:[%s4143_s0 + $0x176] sm:$0x3]  ;;  %v203_v21 = vld [vmem:[%s4143_s0 + $0x178] sm:$0x3] }
  0x53   :  { %v1251_v2 = vsel %vm1110_vm9, %v1250_v37, %v1249_v4  ;;  %v810_v13 = vmax.f32 %v298_v43, %v554_v54  ;;  %v811_v14 = vmax.f32 %v299_v46, %v555_v5  ;;  %v812_v15 = vmax.f32 %v300_v10, %v556_v58  ;;  %v205_v26 = vld [vmem:[%s4143_s0 + $0x17c] sm:$0x3]  ;;  %v206_v33 = vld [vmem:[%s4143_s0 + $0x17e] sm:$0x3] }
  0x54   :  { %1522 = vrot.lane.b32.xlu0 %v3034_v56, %s2530_s17  ;;  %1349 = vst.msk [vmem:[#allocation2 + $0xd1] sm:$0xff] %vm911_vm0, %v1251_v2  ;;  %v813_v16 = vmax.f32 %v301_v47, %v557_v59  ;;  %v814_v22 = vmax.f32 %v302_v49, %v558_v60  ;;  %v1140_v23 = vrot.slane %v808_v6, 7  ;;  %v1142_v24 = vrot.slane %v809_v7, 6  ;;  %v80_v60 = vld [vmem:[%s4143_s0 + $0x82] sm:$0x3] }
  0x55   :  { %1726 = vrot.lane.b32.xlu1 %v3021_v39, %s2533_s5  ;;  %v359_v27 = vmax.f32 %v191_v55, %v199_v63  ;;  %v1144_v29 = vrot.slane %v810_v13, 5  ;;  %v1146_v30 = vrot.slane %v811_v14, 4  ;;  %v1148_v31 = vrot.slane %v812_v15, 3  ;;  %v87_v63 = vld [vmem:[%s4143_s0 + $0x90] sm:$0x3]  ;;  %v3140_v15 = vld [vmem:[#allocation2 + $0xc2] sm:$0xff] }
  0x56   :  { %v1150_v32 = vrot.slane %v813_v16, 2  ;;  %v1141_v34 = vsel %vm1092_vm3, %v1140_v23, %v807_v3  ;;  %v1152_v35 = vrot.slane %v814_v22, 1  ;;  %v360_v36 = vmax.f32 %v192_v61, %v200_v12  ;;  %v81_v61 = vld [vmem:[%s4143_s0 + $0x84] sm:$0x3]  ;;  %v88_v12 = vld [vmem:[%s4143_s0 + $0x92] sm:$0x3] }
  0x57   :  { %v361_v37 = vmax.f32 %v193_v62, %v201_v19  ;;  %v1143_v38 = vsel %vm1095_vm4, %v1142_v24, %v1141_v34  ;;  %v362_v40 = vmax.f32 %v194_v8, %v202_v20  ;;  %v363_v41 = vmax.f32 %v195_v9, %v203_v21  ;;  %v82_v62 = vld [vmem:[%s4143_s0 + $0x86] sm:$0x3]  ;;  %v83_v8 = vld [vmem:[%s4143_s0 + $0x88] sm:$0x3]  ;;  %v84_v9 = vld [vmem:[%s4143_s0 + $0x8a] sm:$0x3] }
  0x58   :  { %1584 = vrot.lane.b32.xlu0 %v3046_v0, %s2531_s18  ;;  %v364_v42 = vmax.f32 %v196_v11, %v204_v25  ;;  %v1145_v43 = vsel %vm1098_vm5, %v1144_v29, %v1143_v38  ;;  %v365_v44 = vmax.f32 %v197_v17, %v205_v26  ;;  %v366_v46 = vmax.f32 %v198_v18, %v206_v33  ;;  %v85_v11 = vld [vmem:[%s4143_s0 + $0x8c] sm:$0x3]  ;;  %v89_v13 = vld [vmem:[%s4143_s0 + $0x94] sm:$0x3]  ;;  %v90_v14 = vld [vmem:[%s4143_s0 + $0x96] sm:$0x3] }
  0x59   :  { %1788 = vrot.lane.b32.xlu1 %v2867_v28, %s2534_s16  ;;  %v615_v10 = vrot.slane %v359_v27, 1  ;;  %v1147_v47 = vsel %vm1101_vm6, %v1146_v30, %v1145_v43  ;;  %v616_v48 = vrot.slane %v360_v36, 1  ;;  %v617_v49 = vrot.slane %v361_v37, 1  ;;  %v79_v28 = vld [vmem:[%s4143_s0 + $0x80] sm:$0x3]  ;;  %v3163_v34 = vld [vmem:[#allocation2 + $0x32] sm:$0xff] }
  0x5a   :  { %v618_v50 = vrot.slane %v362_v40, 1  ;;  %v1149_v52 = vsel %vm1104_vm7, %v1148_v31, %v1147_v47  ;;  %v619_v53 = vrot.slane %v363_v41, 1  ;;  %v620_v54 = vrot.slane %v364_v42, 1  ;;  %v86_v20 = vld [vmem:[%s4143_s0 + $0x8e] sm:$0x3] }
  0x5b   :  { %v3098_v51 = vld [vmem:[#allocation2 + $0xd1] sm:$0xff]  ;;  %v621_v5 = vrot.slane %v365_v44, 1  ;;  %v1151_v55 = vsel %vm1107_vm8, %v1150_v32, %v1149_v52  ;;  %v622_v4 = vrot.slane %v366_v46, 1  ;;  %v871_v58 = vmax.f32 %v359_v27, %v615_v10  ;;  %v92_v22 = vld [vmem:[%s4143_s0 + $0x9a] sm:$0x3] }
  0x5c   :  { %1774 = vrot.lane.b32.xlu0 %v3046_v0, %s2534_s16  ;;  %v872_v59 = vmax.f32 %v360_v36, %v616_v48  ;;  %v1153_v2 = vsel %vm1110_vm9, %v1152_v35, %v1151_v55  ;;  %v873_v3 = vmax.f32 %v361_v37, %v617_v49  ;;  %v874_v6 = vmax.f32 %v362_v40, %v618_v50  ;;  %v91_v21 = vld [vmem:[%s4143_s0 + $0x98] sm:$0x3]  ;;  %v93_v26 = vld [vmem:[%s4143_s0 + $0x9c] sm:$0x3]  ;;  %v94_v33 = vld [vmem:[%s4143_s0 + $0x9e] sm:$0x3] }
  0x5d   :  { %1538 = vrot.lane.b32.xlu1 %v3098_v51, %s2530_s17  ;;  %v875_v7 = vmax.f32 %v363_v41, %v619_v53  ;;  %1342 = vst.msk [vmem:[#allocation2 + $0x41] sm:$0xff] %vm911_vm0, %v1153_v2  ;;  %v876_v16 = vmax.f32 %v364_v42, %v620_v54  ;;  %v877_v17 = vmax.f32 %v365_v44, %v621_v5  ;;  %v207_v52 = vld [vmem:[%s4143_s0 + $0x180] sm:$0x3]  ;;  %v1405_v53 = vld [vmem:[#allocation2 + $0x30] sm:$0xff]  ;;  %v210_v2 = vld [vmem:[%s4143_s0 + $0x186] sm:$0x3] }
  0x5e   :  { %v878_v18 = vmax.f32 %v366_v46, %v622_v4  ;;  %v1252_v19 = vrot.slane %v872_v59, 7  ;;  %v1254_v23 = vrot.slane %v873_v3, 6  ;;  %v1256_v24 = vrot.slane %v874_v6, 5  ;;  %v208_v4 = vld [vmem:[%s4143_s0 + $0x182] sm:$0x3] }
  0x5f   :  { %v1258_v25 = vrot.slane %v875_v7, 4  ;;  %v303_v27 = vmax.f32 %v79_v28, %v87_v63  ;;  %v1260_v30 = vrot.slane %v876_v16, 3  ;;  %v1262_v31 = vrot.slane %v877_v17, 2  ;;  %v215_v59 = vld [vmem:[%s4143_s0 + $0x190] sm:$0x3] }
  0x60   :  { %1836 = vrot.lane.b32.xlu0 %v2897_v1, %s2535_s12  ;;  %v1253_v29 = vsel %vm1092_vm3, %v1252_v19, %v871_v58  ;;  %v1264_v32 = vrot.slane %v878_v18, 1  ;;  %v304_v36 = vmax.f32 %v80_v60, %v88_v12  ;;  %v305_v37 = vmax.f32 %v81_v61, %v89_v13  ;;  %v209_v58 = vld [vmem:[%s4143_s0 + $0x184] sm:$0x3]  ;;  %v211_v3 = vld [vmem:[%s4143_s0 + $0x188] sm:$0x3] }
  0x61   :  { %1600 = vrot.lane.b32.xlu1 %v3140_v15, %s2531_s18  ;;  %v1255_v35 = vsel %vm1095_vm4, %v1254_v23, %v1253_v29  ;;  %v306_v38 = vmax.f32 %v82_v62, %v90_v14  ;;  %v307_v40 = vmax.f32 %v83_v8, %v91_v21  ;;  %v308_v41 = vmax.f32 %v84_v9, %v92_v22  ;;  %v212_v6 = vld [vmem:[%s4143_s0 + $0x18a] sm:$0x3]  ;;  %v216_v7 = vld [vmem:[%s4143_s0 + $0x192] sm:$0x3]  ;;  %v213_v13 = vld [vmem:[%s4143_s0 + $0x18c] sm:$0x3] }
  0x62   :  { %v1257_v1 = vsel %vm1098_vm5, %v1256_v24, %v1255_v35  ;;  %v309_v42 = vmax.f32 %v85_v11, %v93_v26  ;;  %v310_v44 = vmax.f32 %v86_v20, %v94_v33  ;;  %v559_v46 = vrot.slane %v303_v27, 1  ;;  %v214_v14 = vld [vmem:[%s4143_s0 + $0x18e] sm:$0x3]  ;;  %v217_v16 = vld [vmem:[%s4143_s0 + $0x194] sm:$0x3] }
  0x63   :  { %v1259_v43 = vsel %vm1101_vm6, %v1258_v25, %v1257_v1  ;;  %v560_v10 = vrot.slane %v304_v36, 1  ;;  %v561_v48 = vrot.slane %v305_v37, 1  ;;  %v562_v49 = vrot.slane %v306_v38, 1  ;;  %v218_v17 = vld [vmem:[%s4143_s0 + $0x196] sm:$0x3] }
  0x64   :  { %1586 = vrot.lane.b32.xlu0 %v3163_v34, %s2531_s18  ;;  %v1261_v47 = vsel %vm1104_vm7, %v1260_v30, %v1259_v43  ;;  %v563_v50 = vrot.slane %v307_v40, 1  ;;  %v564_v5 = vrot.slane %v308_v41, 1  ;;  %v565_v28 = vrot.slane %v309_v42, 1  ;;  %v219_v18 = vld [vmem:[%s4143_s0 + $0x198] sm:$0x3] }
  0x65   :  { %1790 = vrot.lane.b32.xlu1 %v3140_v15, %s2534_s16  ;;  %v1263_v54 = vsel %vm1107_vm8, %v1262_v31, %v1261_v47  ;;  %v566_v55 = vrot.slane %v310_v44, 1  ;;  %v815_v61 = vmax.f32 %v303_v27, %v559_v46  ;;  %v816_v62 = vmax.f32 %v304_v36, %v560_v10  ;;  %v220_v22 = vld [vmem:[%s4143_s0 + $0x19a] sm:$0x3]  ;;  %v221_v23 = vld [vmem:[%s4143_s0 + $0x19c] sm:$0x3]  ;;  %v3227_v31 = vld [vmem:[#allocation2 + $0xd2] sm:$0xff] }
  0x66   :  { %v1265_v60 = vsel %vm1110_vm9, %v1264_v32, %v1263_v54  ;;  %v817_v63 = vmax.f32 %v305_v37, %v561_v48  ;;  %v818_v8 = vmax.f32 %v306_v38, %v562_v49  ;;  %v819_v9 = vmax.f32 %v307_v40, %v563_v50  ;;  %v222_v30 = vld [vmem:[%s4143_s0 + $0x19e] sm:$0x3]  ;;  %v1413_v48 = vld [vmem:[#allocation2 + $0xd0] sm:$0xff] }
  0x67   :  { %1350 = vst.msk [vmem:[#allocation2 + $0xe1] sm:$0xff] %vm911_vm0, %v1265_v60  ;;  %v820_v11 = vmax.f32 %v308_v41, %v564_v5  ;;  %v821_v12 = vmax.f32 %v309_v42, %v565_v28  ;;  %v822_v19 = vmax.f32 %v310_v44, %v566_v55  ;;  %v1154_v20 = vrot.slane %v816_v62, 7 }
  0x68   :  { %1648 = vrot.lane.b32.xlu0 %v1405_v53, %s2532_s7  ;;  %v1156_v21 = vrot.slane %v817_v63, 6  ;;  %v367_v24 = vmax.f32 %v207_v52, %v215_v59  ;;  %v1158_v25 = vrot.slane %v818_v8, 5  ;;  %v1160_v26 = vrot.slane %v819_v9, 4  ;;  %v97_v63 = vld [vmem:[%s4143_s0 + $0xa4] sm:$0x3] }
  0x69   :  { %1852 = vrot.lane.b32.xlu1 %v2960_v57, %s2535_s12  ;;  %v1162_v27 = vrot.slane %v820_v11, 3  ;;  %v1164_v29 = vrot.slane %v821_v12, 2  ;;  %v1155_v32 = vsel %vm1092_vm3, %v1154_v20, %v815_v61  ;;  %v1166_v33 = vrot.slane %v822_v19, 1  ;;  %v3266_v8 = vld [vmem:[#allocation2 + $0x40] sm:$0xff]  ;;  %v107_v19 = vld [vmem:[%s4143_s0 + $0xb8] sm:$0x3] }
  0x6a   :  { %v368_v35 = vmax.f32 %v208_v4, %v216_v7  ;;  %v369_v36 = vmax.f32 %v209_v58, %v217_v16  ;;  %v1157_v37 = vsel %vm1095_vm4, %v1156_v21, %v1155_v32  ;;  %v370_v38 = vmax.f32 %v210_v2, %v218_v17  ;;  %v95_v4 = vld [vmem:[%s4143_s0 + $0xa0] sm:$0x3]  ;;  %v96_v58 = vld [vmem:[%s4143_s0 + $0xa2] sm:$0x3]  ;;  %v98_v2 = vld [vmem:[%s4143_s0 + $0xa6] sm:$0x3] }
  0x6b   :  { %v371_v1 = vmax.f32 %v211_v3, %v219_v18  ;;  %v372_v57 = vmax.f32 %v212_v6, %v220_v22  ;;  %v1159_v40 = vsel %vm1098_vm5, %v1158_v25, %v1157_v37  ;;  %v373_v41 = vmax.f32 %v213_v13, %v221_v23  ;;  %v99_v3 = vld [vmem:[%s4143_s0 + $0xa8] sm:$0x3]  ;;  %v104_v6 = vld [vmem:[%s4143_s0 + $0xb2] sm:$0x3]  ;;  %v105_v7 = vld [vmem:[%s4143_s0 + $0xb4] sm:$0x3] }
  0x6c   :  { %1838 = vrot.lane.b32.xlu0 %v1405_v53, %s2535_s12  ;;  %v374_v42 = vmax.f32 %v214_v14, %v222_v30  ;;  %v623_v43 = vrot.slane %v367_v24, 1  ;;  %v1161_v44 = vsel %vm1101_vm6, %v1160_v26, %v1159_v40  ;;  %v624_v46 = vrot.slane %v368_v35, 1  ;;  %v100_v14 = vld [vmem:[%s4143_s0 + $0xaa] sm:$0x3]  ;;  %v101_v16 = vld [vmem:[%s4143_s0 + $0xac] sm:$0x3] }
  0x6d   :  { %1602 = vrot.lane.b32.xlu1 %v3227_v31, %s2531_s18  ;;  %v625_v10 = vrot.slane %v369_v36, 1  ;;  %v626_v47 = vrot.slane %v370_v38, 1  ;;  %v1163_v49 = vsel %vm1104_vm7, %v1162_v27, %v1161_v44  ;;  %v627_v50 = vrot.slane %v371_v1, 1  ;;  %v102_v17 = vld [vmem:[%s4143_s0 + $0xae] sm:$0x3] }
  0x6e   :  { %v628_v52 = vrot.slane %v372_v57, 1  ;;  %v629_v54 = vrot.slane %v373_v41, 1  ;;  %v1165_v53 = vsel %vm1107_vm8, %v1164_v29, %v1163_v49  ;;  %v630_v5 = vrot.slane %v374_v42, 1  ;;  %v106_v18 = vld [vmem:[%s4143_s0 + $0xb6] sm:$0x3] }
  0x6f   :  { %v879_v28 = vmax.f32 %v367_v24, %v623_v43  ;;  %v880_v55 = vmax.f32 %v368_v35, %v624_v46  ;;  %v1167_v59 = vsel %vm1110_vm9, %v1166_v33, %v1165_v53  ;;  %v881_v60 = vmax.f32 %v369_v36, %v625_v10  ;;  %v108_v23 = vld [vmem:[%s4143_s0 + $0xba] sm:$0x3]  ;;  %v109_v27 = vld [vmem:[%s4143_s0 + $0xbc] sm:$0x3]  ;;  %v110_v29 = vld [vmem:[%s4143_s0 + $0xbe] sm:$0x3] }
  0x70   :  { %1900 = vrot.lane.b32.xlu0 %v2953_v45, %s2536_s8  ;;  %v882_v61 = vmax.f32 %v370_v38, %v626_v47  ;;  %v883_v62 = vmax.f32 %v371_v1, %v627_v50  ;;  %v103_v45 = vld [vmem:[%s4143_s0 + $0xb0] sm:$0x3]  ;;  %1343 = vst.msk [vmem:[#allocation2 + $0x51] sm:$0xff] %vm911_vm0, %v1167_v59  ;;  %v884_v9 = vmax.f32 %v372_v57, %v628_v52  ;;  %v3303_v47 = vld [vmem:[#allocation2 + $0xe0] sm:$0xff] }
  0x71   :  { %1664 = vrot.lane.b32.xlu1 %v1413_v48, %s2532_s7  ;;  %v885_v11 = vmax.f32 %v373_v41, %v629_v54  ;;  %v886_v12 = vmax.f32 %v374_v42, %v630_v5  ;;  %v1266_v13 = vrot.slane %v880_v55, 7  ;;  %v1268_v20 = vrot.slane %v881_v60, 6  ;;  %v223_v54 = vld [vmem:[%s4143_s0 + $0x1a0] sm:$0x3]  ;;  %v226_v59 = vld [vmem:[%s4143_s0 + $0x1a6] sm:$0x3] }
  0x72   :  { %v1270_v21 = vrot.slane %v882_v61, 5  ;;  %v1272_v22 = vrot.slane %v883_v62, 4  ;;  %v1274_v25 = vrot.slane %v884_v9, 3  ;;  %v311_v33 = vmax.f32 %v95_v4, %v103_v45  ;;  %v224_v4 = vld [vmem:[%s4143_s0 + $0x1a2] sm:$0x3] }
  0x73   :  { %v1267_v24 = vsel %vm1092_vm3, %v1266_v13, %v879_v28  ;;  %v1276_v26 = vrot.slane %v885_v11, 2  ;;  %v1278_v32 = vrot.slane %v886_v12, 1  ;;  %v312_v35 = vmax.f32 %v96_v58, %v104_v6  ;;  %v225_v58 = vld [vmem:[%s4143_s0 + $0x1a4] sm:$0x3]  ;;  %v231_v45 = vld [vmem:[%s4143_s0 + $0x1b0] sm:$0x3] }
  0x74   :  { %1650 = vrot.lane.b32.xlu0 %v3266_v8, %s2532_s7  ;;  %v1269_v30 = vsel %vm1095_vm4, %v1268_v20, %v1267_v24  ;;  %v313_v37 = vmax.f32 %v97_v63, %v105_v7  ;;  %v314_v38 = vmax.f32 %v98_v2, %v106_v18  ;;  %v315_v1 = vmax.f32 %v99_v3, %v107_v19  ;;  %v227_v63 = vld [vmem:[%s4143_s0 + $0x1a8] sm:$0x3]  ;;  %v228_v2 = vld [vmem:[%s4143_s0 + $0x1aa] sm:$0x3]  ;;  %v229_v3 = vld [vmem:[%s4143_s0 + $0x1ac] sm:$0x3] }
  0x75   :  { %1854 = vrot.lane.b32.xlu1 %v1413_v48, %s2535_s12  ;;  %v1271_v36 = vsel %vm1098_vm5, %v1270_v21, %v1269_v30  ;;  %v316_v40 = vmax.f32 %v100_v14, %v108_v23  ;;  %v317_v41 = vmax.f32 %v101_v16, %v109_v27  ;;  %v318_v42 = vmax.f32 %v102_v17, %v110_v29  ;;  %v232_v6 = vld [vmem:[%s4143_s0 + $0x1b2] sm:$0x3]  ;;  %v233_v7 = vld [vmem:[%s4143_s0 + $0x1b4] sm:$0x3]  ;;  %v230_v13 = vld [vmem:[%s4143_s0 + $0x1ae] sm:$0x3] }
  0x76   :  { %v1273_v57 = vsel %vm1101_vm6, %v1272_v22, %v1271_v36  ;;  %v567_v44 = vrot.slane %v311_v33, 1  ;;  %v568_v46 = vrot.slane %v312_v35, 1  ;;  %v569_v10 = vrot.slane %v313_v37, 1  ;;  %v234_v14 = vld [vmem:[%s4143_s0 + $0x1b6] sm:$0x3] }
  0x77   :  { %v1275_v43 = vsel %vm1104_vm7, %v1274_v25, %v1273_v57  ;;  %v570_v49 = vrot.slane %v314_v38, 1  ;;  %v571_v50 = vrot.slane %v315_v1, 1  ;;  %v572_v52 = vrot.slane %v316_v40, 1  ;;  %v235_v16 = vld [vmem:[%s4143_s0 + $0x1b8] sm:$0x3] }
  0x78   :  { %1712 = vrot.lane.b32.xlu0 %v3034_v56, %s2533_s5  ;;  %v1277_v48 = vsel %vm1107_vm8, %v1276_v26, %v1275_v43  ;;  %v573_v5 = vrot.slane %v317_v41, 1  ;;  %v574_v28 = vrot.slane %v318_v42, 1  ;;  %v823_v55 = vmax.f32 %v311_v33, %v567_v44  ;;  %v236_v17 = vld [vmem:[%s4143_s0 + $0x1ba] sm:$0x3]  ;;  %v237_v22 = vld [vmem:[%s4143_s0 + $0x1bc] sm:$0x3] }
  0x79   :  { %1916 = vrot.lane.b32.xlu1 %v3021_v39, %s2536_s8  ;;  %v1279_v53 = vsel %vm1110_vm9, %v1278_v32, %v1277_v48  ;;  %v824_v39 = vmax.f32 %v312_v35, %v568_v46  ;;  %v825_v60 = vmax.f32 %v313_v37, %v569_v10  ;;  %v826_v61 = vmax.f32 %v314_v38, %v570_v49  ;;  %v238_v26 = vld [vmem:[%s4143_s0 + $0x1be] sm:$0x3] }
  0x7a   :  { %1351 = vst.msk [vmem:[#allocation2 + $0xf1] sm:$0xff] %vm911_vm0, %v1279_v53  ;;  %v827_v62 = vmax.f32 %v315_v1, %v571_v50  ;;  %v828_v9 = vmax.f32 %v316_v40, %v572_v52  ;;  %v829_v11 = vmax.f32 %v317_v41, %v573_v5  ;;  %v830_v12 = vmax.f32 %v318_v42, %v574_v28  ;;  %v3369_v41 = vld [vmem:[#allocation2 + $0x41] sm:$0xff] }
  0x7b   :  { %v1168_v18 = vrot.slane %v824_v39, 7  ;;  %v1170_v19 = vrot.slane %v825_v60, 6  ;;  %v1172_v20 = vrot.slane %v826_v61, 5  ;;  %v375_v27 = vmax.f32 %v223_v54, %v231_v45  ;;  %v111_v5 = vld [vmem:[%s4143_s0 + $0xc0] sm:$0x3] }
  0x7c   :  { %1902 = vrot.lane.b32.xlu0 %v3034_v56, %s2536_s8  ;;  %v1174_v21 = vrot.slane %v827_v62, 4  ;;  %v1176_v23 = vrot.slane %v828_v9, 3  ;;  %v1178_v24 = vrot.slane %v829_v11, 2  ;;  %v1180_v25 = vrot.slane %v830_v12, 1  ;;  %v112_v28 = vld [vmem:[%s4143_s0 + $0xc2] sm:$0x3] }
  0x7d   :  { %1666 = vrot.lane.b32.xlu1 %v3303_v47, %s2532_s7  ;;  %v1169_v56 = vsel %vm1092_vm3, %v1168_v18, %v823_v55  ;;  %v376_v29 = vmax.f32 %v224_v4, %v232_v6  ;;  %v377_v30 = vmax.f32 %v225_v58, %v233_v7  ;;  %v378_v32 = vmax.f32 %v226_v59, %v234_v14  ;;  %v113_v55 = vld [vmem:[%s4143_s0 + $0xc4] sm:$0x3]  ;;  %v114_v60 = vld [vmem:[%s4143_s0 + $0xc6] sm:$0x3]  ;;  %v115_v61 = vld [vmem:[%s4143_s0 + $0xc8] sm:$0x3] }
  0x7e   :  { %v1171_v33 = vsel %vm1095_vm4, %v1170_v19, %v1169_v56  ;;  %v379_v35 = vmax.f32 %v227_v63, %v235_v16  ;;  %v380_v36 = vmax.f32 %v228_v2, %v236_v17  ;;  %v381_v37 = vmax.f32 %v229_v3, %v237_v22  ;;  %v116_v62 = vld [vmem:[%s4143_s0 + $0xca] sm:$0x3]  ;;  %v119_v63 = vld [vmem:[%s4143_s0 + $0xd0] sm:$0x3]  ;;  %v120_v2 = vld [vmem:[%s4143_s0 + $0xd2] sm:$0x3] }
  0x7f   :  { %v1173_v38 = vsel %vm1098_vm5, %v1172_v20, %v1171_v33  ;;  %v382_v1 = vmax.f32 %v230_v13, %v238_v26  ;;  %v631_v57 = vrot.slane %v375_v27, 1  ;;  %v632_v40 = vrot.slane %v376_v29, 1  ;;  %v121_v3 = vld [vmem:[%s4143_s0 + $0xd4] sm:$0x3]  ;;  %v117_v11 = vld [vmem:[%s4143_s0 + $0xcc] sm:$0x3] }
  0x80   :  { %1964 = vrot.lane.b32.xlu0 %v3046_v0, %s2537_s9  ;;  %v1175_v42 = vsel %vm1101_vm6, %v1174_v21, %v1173_v38  ;;  %v633_v43 = vrot.slane %v377_v30, 1  ;;  %v634_v44 = vrot.slane %v378_v32, 1  ;;  %v635_v46 = vrot.slane %v379_v35, 1  ;;  %v118_v12 = vld [vmem:[%s4143_s0 + $0xce] sm:$0x3]  ;;  %v3435_v33 = vld [vmem:[#allocation2 + $0xe1] sm:$0xff] }
  0x81   :  { %1728 = vrot.lane.b32.xlu1 %v3098_v51, %s2533_s5  ;;  %v1177_v10 = vsel %vm1104_vm7, %v1176_v23, %v1175_v42  ;;  %v636_v48 = vrot.slane %v380_v36, 1  ;;  %v637_v49 = vrot.slane %v381_v37, 1  ;;  %v638_v0 = vrot.slane %v382_v1, 1  ;;  %v122_v13 = vld [vmem:[%s4143_s0 + $0xd6] sm:$0x3] }
  0x82   :  { %v1179_v50 = vsel %vm1107_vm8, %v1178_v24, %v1177_v10  ;;  %v887_v52 = vmax.f32 %v375_v27, %v631_v57  ;;  %v888_v54 = vmax.f32 %v376_v29, %v632_v40  ;;  %v889_v53 = vmax.f32 %v377_v30, %v633_v43  ;;  %v124_v17 = vld [vmem:[%s4143_s0 + $0xda] sm:$0x3]  ;;  %v125_v18 = vld [vmem:[%s4143_s0 + $0xdc] sm:$0x3]  ;;  %v126_v23 = vld [vmem:[%s4143_s0 + $0xde] sm:$0x3] }
  0x83   :  { %v1181_v4 = vsel %vm1110_vm9, %v1180_v25, %v1179_v50  ;;  %v890_v58 = vmax.f32 %v378_v32, %v634_v44  ;;  %v891_v59 = vmax.f32 %v379_v35, %v635_v46  ;;  %v892_v39 = vmax.f32 %v380_v36, %v636_v48  ;;  %v240_v50 = vld [vmem:[%s4143_s0 + $0x1c2] sm:$0x3] }
  0x84   :  { %1524 = vrot.lane.b32.xlu0 %v3369_v41, %s2530_s17  ;;  %1344 = vst.msk [vmem:[#allocation2 + $0x61] sm:$0xff] %vm911_vm0, %v1181_v4  ;;  %v893_v45 = vmax.f32 %v381_v37, %v637_v49  ;;  %v894_v6 = vmax.f32 %v382_v1, %v638_v0  ;;  %v1280_v7 = vrot.slane %v888_v54, 7  ;;  %v1282_v9 = vrot.slane %v889_v53, 6  ;;  %v239_v0 = vld [vmem:[%s4143_s0 + $0x1c0] sm:$0x3] }
  0x85   :  { %1918 = vrot.lane.b32.xlu1 %v3098_v51, %s2536_s8  ;;  %v123_v51 = vld [vmem:[%s4143_s0 + $0xd8] sm:$0x3]  ;;  %v1284_v14 = vrot.slane %v890_v58, 5  ;;  %v1286_v16 = vrot.slane %v891_v59, 4  ;;  %v1288_v20 = vrot.slane %v892_v39, 3  ;;  %v319_v25 = vmax.f32 %v111_v5, %v119_v63 }
  0x86   :  { %v1281_v19 = vsel %vm1092_vm3, %v1280_v7, %v887_v52  ;;  %v1290_v21 = vrot.slane %v893_v45, 2  ;;  %v1292_v22 = vrot.slane %v894_v6, 1  ;;  %v320_v26 = vmax.f32 %v112_v28, %v120_v2  ;;  %v241_v52 = vld [vmem:[%s4143_s0 + $0x1c4] sm:$0x3]  ;;  %v243_v4 = vld [vmem:[%s4143_s0 + $0x1c8] sm:$0x3] }
  0x87   :  { %v1283_v24 = vsel %vm1095_vm4, %v1282_v9, %v1281_v19  ;;  %v321_v27 = vmax.f32 %v113_v55, %v121_v3  ;;  %v322_v29 = vmax.f32 %v114_v60, %v122_v13  ;;  %v323_v30 = vmax.f32 %v115_v61, %v123_v51  ;;  %v242_v55 = vld [vmem:[%s4143_s0 + $0x1c6] sm:$0x3]  ;;  %v247_v58 = vld [vmem:[%s4143_s0 + $0x1d0] sm:$0x3]  ;;  %v248_v59 = vld [vmem:[%s4143_s0 + $0x1d2] sm:$0x3] }
  0x88   :  { %1714 = vrot.lane.b32.xlu0 %v3369_v41, %s2533_s5  ;;  %v1285_v56 = vsel %vm1098_vm5, %v1284_v14, %v1283_v24  ;;  %v324_v32 = vmax.f32 %v116_v62, %v124_v17  ;;  %v325_v36 = vmax.f32 %v117_v11, %v125_v18  ;;  %v326_v37 = vmax.f32 %v118_v12, %v126_v23  ;;  %v249_v39 = vld [vmem:[%s4143_s0 + $0x1d4] sm:$0x3]  ;;  %v244_v63 = vld [vmem:[%s4143_s0 + $0x1ca] sm:$0x3]  ;;  %v245_v2 = vld [vmem:[%s4143_s0 + $0x1cc] sm:$0x3] }
  0x89   :  { %1980 = vrot.lane.b32.xlu1 %v3140_v15, %s2537_s9  ;;  %v1287_v35 = vsel %vm1101_vm6, %v1286_v16, %v1285_v56  ;;  %v575_v38 = vrot.slane %v319_v25, 1  ;;  %v576_v57 = vrot.slane %v320_v26, 1  ;;  %v577_v40 = vrot.slane %v321_v27, 1  ;;  %v246_v3 = vld [vmem:[%s4143_s0 + $0x1ce] sm:$0x3]  ;;  %v3495_v51 = vld [vmem:[#allocation2 + $0x51] sm:$0xff] }
  0x8a   :  { %v1289_v1 = vsel %vm1104_vm7, %v1288_v20, %v1287_v35  ;;  %v578_v42 = vrot.slane %v322_v29, 1  ;;  %v579_v43 = vrot.slane %v323_v30, 1  ;;  %v580_v44 = vrot.slane %v324_v32, 1  ;;  %v250_v45 = vld [vmem:[%s4143_s0 + $0x1d6] sm:$0x3] }
  0x8b   :  { %v1291_v15 = vsel %vm1107_vm8, %v1290_v21, %v1289_v1  ;;  %v581_v10 = vrot.slane %v325_v36, 1  ;;  %v582_v48 = vrot.slane %v326_v37, 1  ;;  %v831_v49 = vmax.f32 %v319_v25, %v575_v38  ;;  %v251_v6 = vld [vmem:[%s4143_s0 + $0x1d8] sm:$0x3]  ;;  %v252_v7 = vld [vmem:[%s4143_s0 + $0x1da] sm:$0x3] }
  0x8c   :  { %1776 = vrot.lane.b32.xlu0 %v3163_v34, %s2534_s16  ;;  %v1293_v46 = vsel %vm1110_vm9, %v1292_v22, %v1291_v15  ;;  %v832_v54 = vmax.f32 %v320_v26, %v576_v57  ;;  %v833_v53 = vmax.f32 %v321_v27, %v577_v40  ;;  %v834_v5 = vmax.f32 %v322_v29, %v578_v42  ;;  %v253_v13 = vld [vmem:[%s4143_s0 + $0x1dc] sm:$0x3]  ;;  %v254_v18 = vld [vmem:[%s4143_s0 + $0x1de] sm:$0x3]  ;;  %v3504_v26 = vpop.permute.xlu0 %1516 }
  0x8d   :  { %1540 = vrot.lane.b32.xlu1 %v3435_v33, %s2530_s17  ;;  %1352 = vst.msk [vmem:[#allocation2 + $0x101] sm:$0xff] %vm911_vm0, %v1293_v46  ;;  %v835_v28 = vmax.f32 %v323_v30, %v579_v43  ;;  %v836_v60 = vmax.f32 %v324_v32, %v580_v44  ;;  %v837_v61 = vmax.f32 %v325_v36, %v581_v10  ;;  %v3509_v32 = vld [vmem:[#allocation2 + $0x42] sm:$0xff]  ;;  %v127_v10 = vld [vmem:[%s4143_s0 + $0xe0] sm:$0x3] }
  0x8e   :  { %v838_v62 = vmax.f32 %v326_v37, %v582_v48  ;;  %v1182_v9 = vrot.slane %v832_v54, 7  ;;  %v1184_v11 = vrot.slane %v833_v53, 6  ;;  %v1186_v12 = vrot.slane %v834_v5, 5  ;;  %v128_v48 = vld [vmem:[%s4143_s0 + $0xe2] sm:$0x3] }
  0x8f   :  { %v1188_v14 = vrot.slane %v835_v28, 4  ;;  %v1190_v16 = vrot.slane %v836_v60, 3  ;;  %v1192_v17 = vrot.slane %v837_v61, 2  ;;  %v383_v19 = vmax.f32 %v239_v0, %v247_v58  ;;  %v135_v0 = vld [vmem:[%s4143_s0 + $0xf0] sm:$0x3] }
  0x90   :  { %1966 = vrot.lane.b32.xlu0 %v3163_v34, %s2537_s9  ;;  %v1183_v34 = vsel %vm1092_vm3, %v1182_v9, %v831_v49  ;;  %v384_v20 = vmax.f32 %v240_v50, %v248_v59  ;;  %v385_v21 = vmax.f32 %v241_v52, %v249_v39  ;;  %v1194_v23 = vrot.slane %v838_v62, 1  ;;  %v129_v49 = vld [vmem:[%s4143_s0 + $0xe4] sm:$0x3]  ;;  %v130_v5 = vld [vmem:[%s4143_s0 + $0xe6] sm:$0x3] }
  0x91   :  { %1730 = vrot.lane.b32.xlu1 %v3435_v33, %s2533_s5  ;;  %v1185_v22 = vsel %vm1095_vm4, %v1184_v11, %v1183_v34  ;;  %v386_v24 = vmax.f32 %v242_v55, %v250_v45  ;;  %v387_v25 = vmax.f32 %v243_v4, %v251_v6  ;;  %v388_v56 = vmax.f32 %v244_v63, %v252_v7  ;;  %v131_v28 = vld [vmem:[%s4143_s0 + $0xe8] sm:$0x3]  ;;  %v132_v55 = vld [vmem:[%s4143_s0 + $0xea] sm:$0x3]  ;;  %v136_v4 = vld [vmem:[%s4143_s0 + $0xf2] sm:$0x3] }
  0x92   :  { %v1187_v27 = vsel %vm1098_vm5, %v1186_v12, %v1185_v22  ;;  %v389_v29 = vmax.f32 %v245_v2, %v253_v13  ;;  %v390_v30 = vmax.f32 %v246_v3, %v254_v18  ;;  %v639_v36 = vrot.slane %v383_v19, 1  ;;  %v137_v58 = vld [vmem:[%s4143_s0 + $0xf4] sm:$0x3]  ;;  %v138_v59 = vld [vmem:[%s4143_s0 + $0xf6] sm:$0x3] }
  0x93   :  { %v1189_v35 = vsel %vm1101_vm6, %v1188_v14, %v1187_v27  ;;  %v640_v37 = vrot.slane %v384_v20, 1  ;;  %v641_v38 = vrot.slane %v385_v21, 1  ;;  %v642_v57 = vrot.slane %v386_v24, 1  ;;  %v133_v62 = vld [vmem:[%s4143_s0 + $0xec] sm:$0x3] }
  0x94   :  { %1526 = vrot.lane.b32.xlu0 %v3495_v51, %s2530_s17  ;;  %v1191_v1 = vsel %vm1104_vm7, %v1190_v16, %v1189_v35  ;;  %v643_v40 = vrot.slane %v387_v25, 1  ;;  %v644_v15 = vrot.slane %v388_v56, 1  ;;  %v645_v43 = vrot.slane %v389_v29, 1  ;;  %v134_v63 = vld [vmem:[%s4143_s0 + $0xee] sm:$0x3] }
  0x95   :  { %1792 = vrot.lane.b32.xlu1 %v3227_v31, %s2534_s16  ;;  %v1193_v42 = vsel %vm1107_vm8, %v1192_v17, %v1191_v1  ;;  %v646_v44 = vrot.slane %v390_v30, 1  ;;  %v895_v46 = vmax.f32 %v383_v19, %v639_v36  ;;  %v896_v52 = vmax.f32 %v384_v20, %v640_v37  ;;  %v139_v2 = vld [vmem:[%s4143_s0 + $0xf8] sm:$0x3] }
  0x96   :  { %v1195_v50 = vsel %vm1110_vm9, %v1194_v23, %v1193_v42  ;;  %v897_v54 = vmax.f32 %v385_v21, %v641_v38  ;;  %v898_v53 = vmax.f32 %v386_v24, %v642_v57  ;;  %v899_v39 = vmax.f32 %v387_v25, %v643_v40 }
  0x97   :  { %1345 = vst.msk [vmem:[#allocation2 + $0x71] sm:$0xff] %vm911_vm0, %v1195_v50  ;;  %v900_v60 = vmax.f32 %v388_v56, %v644_v15  ;;  %v901_v61 = vmax.f32 %v389_v29, %v645_v43 }
  0x98   :  { %1588 = vrot.lane.b32.xlu0 %v3509_v32, %s2531_s18 }
  0x99   :  { %1982 = vrot.lane.b32.xlu1 %v3227_v31, %s2537_s9  ;;  %v140_v31 = vld [vmem:[%s4143_s0 + $0xfa] sm:$0x3] }
  0x9a   :  { %8 = vsyncpa [#allocation4], 0  ;;  %v3562_v3 = vld [vmem:[#allocation2 + $0xf1] sm:$0xff]  ;;  %v3564_v45 = vpop.permute.xlu0 %1532  ;;  %v902_v6 = vmax.f32 %v390_v30, %v646_v44  ;;  %v1294_v7 = vrot.slane %v896_v52, 7  ;;  %v1296_v9 = vrot.slane %v897_v54, 6  ;;  %v1298_v11 = vrot.slane %v898_v53, 5  ;;  %v3577_v21 = vpop.permute.xlu1 %1596 }
  0x9b   :  { %v141_v12 = vld [vmem:[%s4143_s0 + $0xfc] sm:$0x3]  ;;  %v1300_v13 = vrot.slane %v899_v39, 4  ;;  %v1302_v14 = vrot.slane %v900_v60, 3  ;;  %v1304_v16 = vrot.slane %v901_v61, 2  ;;  %v327_v34 = vmax.f32 %v127_v10, %v135_v0  ;;  %v3580_v27 = vld [vmem:[#allocation2 + $0xe2] sm:$0xff] }
  0x9c   :  { %v142_v17 = vld [vmem:[%s4143_s0 + $0xfe] sm:$0x3]  ;;  %1778 = vrot.lane.b32.xlu0 %v3509_v32, %s2534_s16  ;;  %v1295_v18 = vsel %vm1092_vm3, %v1294_v7, %v895_v46  ;;  %v328_v19 = vmax.f32 %v128_v48, %v136_v4  ;;  %v329_v20 = vmax.f32 %v129_v49, %v137_v58  ;;  %v330_v23 = vmax.f32 %v130_v5, %v138_v59  ;;  %v3591_v43 = vld [vmem:[#allocation2 + $0x52] sm:$0xff]  ;;  %v2147_v50 = vld [vmem:[%s4144_s1] sm:$0xff] }
  0x9d   :  { %1542 = vrot.lane.b32.xlu1 %v3562_v3, %s2530_s17  ;;  %v1297_v22 = vsel %vm1095_vm4, %v1296_v9, %v1295_v18  ;;  %v331_v24 = vmax.f32 %v131_v28, %v139_v2  ;;  %v332_v25 = vmax.f32 %v132_v55, %v140_v31  ;;  %v1306_v29 = vrot.slane %v902_v6, 1  ;;  %v255_v52 = vld [vmem:[%s4143_s0 + $0x1e0] sm:$0x3]  ;;  %v256_v54 = vld [vmem:[%s4143_s0 + $0x1e2] sm:$0x3]  ;;  %v2148_v6 = vld [vmem:[%s4144_s1 + $0x8] sm:$0xff] }
  0x9e   :  { %v1299_v56 = vsel %vm1098_vm5, %v1298_v11, %v1297_v22  ;;  %v333_v30 = vmax.f32 %v133_v62, %v141_v12  ;;  %v334_v35 = vmax.f32 %v134_v63, %v142_v17  ;;  %v583_v37 = vrot.slane %v327_v34, 1  ;;  %v3586_v1 = vpop.permute.xlu0 %1580  ;;  %v3604_v53 = vpop.permute.xlu1 %1518  ;;  %v257_v58 = vld [vmem:[%s4143_s0 + $0x1e4] sm:$0x3]  ;;  %v258_v59 = vld [vmem:[%s4143_s0 + $0x1e6] sm:$0x3] }
  0x9f   :  { %v1301_v36 = vsel %vm1101_vm6, %v1300_v13, %v1299_v56  ;;  %v584_v38 = vrot.slane %v328_v19, 1  ;;  %v585_v40 = vrot.slane %v329_v20, 1  ;;  %v586_v15 = vrot.slane %v330_v23, 1  ;;  %v259_v39 = vld [vmem:[%s4143_s0 + $0x1e8] sm:$0x3]  ;;  %v1407_v13 = vld [vmem:[#allocation2 + $0x50] sm:$0xff] }
  0xa0   :  { %1840 = vrot.lane.b32.xlu0 %v3266_v8, %s2535_s12  ;;  %v1303_v57 = vsel %vm1104_vm7, %v1302_v14, %v1301_v36  ;;  %v587_v42 = vrot.slane %v331_v24, 1  ;;  %v588_v46 = vrot.slane %v332_v25, 1  ;;  %v589_v10 = vrot.slane %v333_v30, 1  ;;  %v263_v60 = vld [vmem:[%s4143_s0 + $0x1f0] sm:$0x3] }
  0xa1   :  { %1604 = vrot.lane.b32.xlu1 %v3580_v27, %s2531_s18  ;;  %v1305_v44 = vsel %vm1107_vm8, %v1304_v16, %v1303_v57  ;;  %v590_v48 = vrot.slane %v334_v35, 1  ;;  %v839_v8 = vmax.f32 %v327_v34, %v583_v37  ;;  %v840_v0 = vmax.f32 %v328_v19, %v584_v38  ;;  %v264_v61 = vld [vmem:[%s4143_s0 + $0x1f2] sm:$0x3]  ;;  %v265_v62 = vld [vmem:[%s4143_s0 + $0x1f4] sm:$0x3] }
  0xa2   :  { %v1307_v49 = vsel %vm1110_vm9, %v1306_v29, %v1305_v44  ;;  %v841_v5 = vmax.f32 %v329_v20, %v585_v40  ;;  %v842_v28 = vmax.f32 %v330_v23, %v586_v15  ;;  %v843_v55 = vmax.f32 %v331_v24, %v587_v42  ;;  %v260_v7 = vld [vmem:[%s4143_s0 + $0x1ea] sm:$0x3]  ;;  %v261_v9 = vld [vmem:[%s4143_s0 + $0x1ec] sm:$0x3]  ;;  %v266_v11 = vld [vmem:[%s4143_s0 + $0x1f6] sm:$0x3]  ;;  %v3647_v34 = vpop.permute.xlu0 %1582 }
  0xa3   :  { %1353 = vst.msk [vmem:[#allocation2 + $0x111] sm:$0xff] %vm911_vm0, %v1307_v49  ;;  %v844_v4 = vmax.f32 %v332_v25, %v588_v46  ;;  %v845_v63 = vmax.f32 %v333_v30, %v589_v10  ;;  %v846_v2 = vmax.f32 %v334_v35, %v590_v48  ;;  %v1196_v31 = vrot.slane %v840_v0, 7  ;;  %v267_v12 = vld [vmem:[%s4143_s0 + $0x1f8] sm:$0x3]  ;;  %v268_v18 = vld [vmem:[%s4143_s0 + $0x1fa] sm:$0x3] }
  0xa4   :  { %1590 = vrot.lane.b32.xlu0 %v3591_v43, %s2531_s18  ;;  %v1198_v14 = vrot.slane %v841_v5, 6  ;;  %v1200_v16 = vrot.slane %v842_v28, 5  ;;  %v1202_v17 = vrot.slane %v843_v55, 4  ;;  %v269_v24 = vld [vmem:[%s4143_s0 + $0x1fc] sm:$0x3]  ;;  %v2478_v56 = vpack.c.bf16 %v2148_v6, %v2147_v50  ;;  %v3667_v48 = vld [vmem:[#allocation2 + $0xf2] sm:$0xff] }
  0xa5   :  { %1794 = vrot.lane.b32.xlu1 %v3580_v27, %s2534_s16  ;;  %v1197_v19 = vsel %vm1092_vm3, %v1196_v31, %v839_v8  ;;  %v1204_v20 = vrot.slane %v844_v4, 3  ;;  %v1206_v22 = vrot.slane %v845_v63, 2  ;;  %v1208_v23 = vrot.slane %v846_v2, 1  ;;  %v262_v29 = vld [vmem:[%s4143_s0 + $0x1ee] sm:$0x3]  ;;  %v2150_v63 = vld [vmem:[%s4144_s1 + $0x18] sm:$0xff] }
  0xa6   :  { %v1199_v25 = vsel %vm1095_vm4, %v1198_v14, %v1197_v19  ;;  %v270_v30 = vld [vmem:[%s4143_s0 + $0x1fe] sm:$0x3]  ;;  %v391_v35 = vmax.f32 %v255_v52, %v263_v60  ;;  %v392_v36 = vmax.f32 %v256_v54, %v264_v61  ;;  %v393_v38 = vmax.f32 %v257_v58, %v265_v62  ;;  %2479 = vmatprep.subr.bf16.mxu0 %v2478_v56  ;;  %v3672_v5 = vpop.permute.xlu0 %1644  ;;  %v2149_v62 = vld [vmem:[%s4144_s1 + $0x10] sm:$0xff] }
  0xa7   :  { %v1201_v37 = vsel %vm1098_vm5, %v1200_v16, %v1199_v25  ;;  %v394_v57 = vmax.f32 %v258_v59, %v266_v11  ;;  %v395_v40 = vmax.f32 %v259_v39, %v267_v12  ;;  %v396_v44 = vmax.f32 %v260_v7, %v268_v18  ;;  %2481 = vmatpush3.bf16.msra.mxu0 %v2478_v56  ;;  %v1415_v2 = vld [vmem:[#allocation2 + $0xf0] sm:$0xff]  ;;  %v3689_v18 = vld [vmem:[#allocation2 + $0x60] sm:$0xff] }
  0xa8   :  { %1652 = vrot.lane.b32.xlu0 %v1407_v13, %s2532_s7  ;;  %v1203_v42 = vsel %vm1101_vm6, %v1202_v17, %v1201_v37  ;;  %v397_v46 = vmax.f32 %v261_v9, %v269_v24  ;;  %v647_v10 = vrot.slane %v391_v35, 1  ;;  %v398_v8 = vmax.f32 %v262_v29, %v270_v30  ;;  %2486 = vmatprep.subr.bf16.mxu1 %v2478_v56 }
  0xa9   :  { %1856 = vrot.lane.b32.xlu1 %v3303_v47, %s2535_s12  ;;  %v3664_v15 = vpop.permute.xlu1 %1534  ;;  %v1205_v49 = vsel %vm1104_vm7, %v1204_v20, %v1203_v42  ;;  %v648_v0 = vrot.slane %v392_v36, 1  ;;  %v649_v52 = vrot.slane %v393_v38, 1  ;;  %v650_v47 = vrot.slane %v394_v57, 1  ;;  %2489 = vmatpush3.bf16.msra.mxu1 %v2478_v56 }
  0xaa   :  { %v1207_v50 = vsel %vm1107_vm8, %v1206_v22, %v1205_v49  ;;  %v651_v54 = vrot.slane %v395_v40, 1  ;;  %v652_v55 = vrot.slane %v396_v44, 1  ;;  %v653_v4 = vrot.slane %v397_v46, 1  ;;  %v2151_v22 = vld [vmem:[%s4144_s1 + $0x20] sm:$0xf] }
  0xab   :  { %v1209_v28 = vsel %vm1110_vm9, %v1208_v23, %v1207_v50  ;;  %v654_v58 = vrot.slane %v398_v8, 1  ;;  %v903_v59 = vmax.f32 %v391_v35, %v647_v10  ;;  %v904_v39 = vmax.f32 %v392_v36, %v648_v0  ;;  %v3753_v0 = vld [vmem:[#allocation2 + $0x101] sm:$0xff] }
  0xac   :  { %1842 = vrot.lane.b32.xlu0 %v1407_v13, %s2535_s12  ;;  %1346 = vst.msk [vmem:[#allocation2 + $0x81] sm:$0xff] %vm911_vm0, %v1209_v28  ;;  %v905_v60 = vmax.f32 %v393_v38, %v649_v52  ;;  %v906_v61 = vmax.f32 %v394_v57, %v650_v47  ;;  %v907_v31 = vmax.f32 %v395_v40, %v651_v54  ;;  %vm2208_vm10 = vcmask 1043456   ;;  %v3719_v40 = vld [vmem:[#allocation2 + $0x100] sm:$0xff] }
  0xad   :  { %1606 = vrot.lane.b32.xlu1 %v3667_v48, %s2531_s18  ;;  %v908_v6 = vmax.f32 %v396_v44, %v652_v55  ;;  %v909_v7 = vmax.f32 %v397_v46, %v653_v4  ;;  %v3684_v9 = vpop.permute.xlu1 %1598  ;;  %v910_v11 = vmax.f32 %v398_v8, %v654_v58  ;;  %v1308_v12 = vrot.slane %v904_v39, 7  ;;  %v3777_v28 = vld [vmem:[#allocation2 + $0x62] sm:$0xff]  ;;  %v3787_v58 = vld [vmem:[#allocation2 + $0x111] sm:$0xff] }
  0xae   :  { %v1310_v13 = vrot.slane %v905_v60, 6  ;;  %v1312_v14 = vrot.slane %v906_v61, 5  ;;  %v1314_v16 = vrot.slane %v907_v31, 4  ;;  %v2482_v17 = vpack.c.bf16 %v2150_v63, %v2149_v62  ;;  %v3797_v60 = vld [vmem:[#allocation2 + $0x102] sm:$0xff]  ;;  %v3811_v31 = vld [vmem:[#allocation2 + $0x70] sm:$0xff] }
  0xaf   :  { %v1309_v19 = vsel %vm1092_vm3, %v1308_v12, %v903_v59  ;;  %v1316_v20 = vrot.slane %v908_v6, 3  ;;  %v1318_v25 = vrot.slane %v909_v7, 2  ;;  %v1320_v56 = vrot.slane %v910_v11, 1  ;;  %v1355_v7 = vld [vmem:[#allocation2] sm:$0xff] }
  0xb0   :  { %1904 = vrot.lane.b32.xlu0 %v3369_v41, %s2536_s8  ;;  %v1311_v24 = vsel %vm1095_vm4, %v1310_v13, %v1309_v19  ;;  %2483 = vmatprep.subr.bf16.mxu0 %v2482_v17  ;;  %vm2028_vm11 = vcmask 64512   ;;  %vm2045_vm12 = vcmask 97280   ;;  %vm2062_vm13 = vcmask 130048  }
  0xb1   :  { %1668 = vrot.lane.b32.xlu1 %v1415_v2, %s2532_s7  ;;  %2487 = vmatprep.subr.bf16.mxu1 %v2482_v17  ;;  %v1313_v41 = vsel %vm1098_vm5, %v1312_v14, %v1311_v24  ;;  %v3704_v30 = vpop.permute.xlu1 %1660  ;;  %v2012_v14 = vsel %vm911_vm0, %v1355_v7, %v3504_v26  ;;  %vm2079_vm14 = vcmask 162816   ;;  %v1365_v24 = vld [vmem:[#allocation2 + $0xc0] sm:$0xff]  ;;  %vm2096_vm15 = vcmask 195584  }
  0xb2   :  { %v3695_v23 = vpop.permute.xlu0 %1646  ;;  %2485 = vmatpush3.bf16.msra.mxu0 %v2482_v17  ;;  %2490 = vmatpush3.bf16.msra.mxu1 %v2482_v17  ;;  %v1315_v29 = vsel %vm1101_vm6, %v1314_v16, %v1313_v41  ;;  %v3841_v41 = vld [vmem:[#allocation2 + $0x110] sm:$0xff]  ;;  %vm2113_vm1 = vcmask 228352   ;;  %vm2130_vm2 = vcmask 261120   ;;  %vm2159_vm3 = vcmask 293888  }
  0xb3   :  { %2452 = vmatprep.subr.msk.mxu0 %vm2208_vm10, %v2151_v22  ;;  %v1317_v35 = vsel %vm1104_vm7, %v1316_v20, %v1315_v29  ;;  %2488 = vmatprep.subr.msk.mxu1 %vm2208_vm10, %v2151_v22 }
  0xb4   :  { %1654 = vrot.lane.b32.xlu0 %v3689_v18, %s2532_s7  ;;  %v1319_v37 = vsel %vm1107_vm8, %v1318_v25, %v1317_v35  ;;  %v1363_v35 = vld [vmem:[#allocation2 + $0xa0] sm:$0xff] }
  0xb5   :  { %1858 = vrot.lane.b32.xlu1 %v1415_v2, %s2535_s12  ;;  %v1321_v38 = vsel %vm1110_vm9, %v1320_v56, %v1319_v37  ;;  %v1357_v2 = vld [vmem:[#allocation2 + $0x20] sm:$0xff] }
  0xb6   :  { %v3708_v36 = vpop.permute.xlu0 %1708  ;;  %2453 = vmatpush3.msk.msra.mxu0 %vm2208_vm10, %v2151_v22  ;;  %2491 = vmatpush3.msk.msra.mxu1 %vm2208_vm10, %v2151_v22  ;;  %1354 = vst.msk [vmem:[#allocation2 + $0x121] sm:$0xff] %vm911_vm0, %v1321_v38  ;;  %v2029_v22 = vsel %vm2028_vm11, %v2012_v14, %v3586_v1  ;;  %v3854_v38 = vld [vmem:[#allocation2 + $0x80] sm:$0xff] }
  0xb7   :  { %v2046_v26 = vsel %vm2045_vm12, %v2029_v22, %v3672_v5 }
  0xb8   :  { %1716 = vrot.lane.b32.xlu0 %v3495_v51, %s2533_s5  ;;  %v2063_v56 = vsel %vm2062_vm13, %v2046_v26, %v3708_v36 }
  0xb9   :  { %1920 = vrot.lane.b32.xlu1 %v3435_v33, %s2536_s8  ;;  %v3735_v33 = vld [vmem:[#allocation2 + $0x61] sm:$0xff] }
  0xba   :  { %v1521_v57 = vpop.permute.xlu0 %1520 }
  0xbb   :  { %v3721_v42 = vpop.permute.xlu1 %1662  ;;  %v2014_v12 = vsel %vm911_vm0, %v1357_v2, %v1521_v57 }
  0xbc   :  { %1906 = vrot.lane.b32.xlu0 %v3495_v51, %s2536_s8 }
  0xbd   :  { %1670 = vrot.lane.b32.xlu1 %v3719_v40, %s2532_s7 }
  0xbe   :  { %v3727_v44 = vpop.permute.xlu0 %1710 }
  0xbf   :  { %v3729_v46 = vpop.permute.xlu1 %1724 }
  0xc0   :  { %1968 = vrot.lane.b32.xlu0 %v3509_v32, %s2537_s9 }
  0xc1   :  { %1732 = vrot.lane.b32.xlu1 %v3562_v3, %s2533_s5 }
  0xc2   :  { %v3737_v10 = vpop.permute.xlu0 %1772 }
  0xc3   :  { %v3739_v49 = vpop.permute.xlu1 %1536  ;;  %v2080_v1 = vsel %vm2079_vm14, %v2063_v56, %v3737_v10 }
  0xc4   :  { %1528 = vrot.lane.b32.xlu0 %v3735_v33, %s2530_s17  ;;  %v2022_v5 = vsel %vm911_vm0, %v1365_v24, %v3739_v49 }
  0xc5   :  { %1922 = vrot.lane.b32.xlu1 %v3562_v3, %s2536_s8 }
  0xc6   :  { %v3745_v51 = vpop.permute.xlu0 %1522 }
  0xc7   :  { %v3747_v8 = vpop.permute.xlu1 %1726 }
  0xc8   :  { %1718 = vrot.lane.b32.xlu0 %v3735_v33, %s2533_s5 }
  0xc9   :  { %1984 = vrot.lane.b32.xlu1 %v3580_v27, %s2537_s9  ;;  %v3769_v27 = vld [vmem:[#allocation2 + $0x71] sm:$0xff] }
  0xca   :  { %v1585_v32 = vpop.permute.xlu0 %1584 }
  0xcb   :  { %v3755_v50 = vpop.permute.xlu1 %1788  ;;  %v2031_v13 = vsel %vm2028_vm11, %v2014_v12, %v1585_v32  ;;  %v2503_v12 = vld [vmem:[#allocation2 + $0x30] sm:$0xff] }
  0xcc   :  { %1780 = vrot.lane.b32.xlu0 %v3591_v43, %s2534_s16 }
  0xcd   :  { %1544 = vrot.lane.b32.xlu1 %v3753_v0, %s2530_s17 }
  0xce   :  { %v3761_v3 = vpop.permute.xlu0 %1774 }
  0xcf   :  { %v3763_v52 = vpop.permute.xlu1 %1538 }
  0xd0   :  { %1970 = vrot.lane.b32.xlu0 %v3591_v43, %s2537_s9 }
  0xd1   :  { %1734 = vrot.lane.b32.xlu1 %v3753_v0, %s2533_s5 }
  0xd2   :  { %v1837_v47 = vpop.permute.xlu0 %1836 }
  0xd3   :  { %v3771_v54 = vpop.permute.xlu1 %1600  ;;  %v2097_v37 = vsel %vm2096_vm15, %v2080_v1, %v1837_v47 }
  0xd4   :  { %1530 = vrot.lane.b32.xlu0 %v3769_v27, %s2530_s17  ;;  %v2039_v36 = vsel %vm2028_vm11, %v2022_v5, %v3771_v54 }
  0xd5   :  { %1796 = vrot.lane.b32.xlu1 %v3667_v48, %s2534_s16 }
  0xd6   :  { %v3779_v55 = vpop.permute.xlu0 %1586 }
  0xd7   :  { %v3781_v4 = vpop.permute.xlu1 %1790 }
  0xd8   :  { %1592 = vrot.lane.b32.xlu0 %v3777_v28, %s2531_s18 }
  0xd9   :  { %1986 = vrot.lane.b32.xlu1 %v3667_v48, %s2537_s9  ;;  %v3805_v48 = vld [vmem:[#allocation2 + $0x72] sm:$0xff] }
  0xda   :  { %v1649_v43 = vpop.permute.xlu0 %1648 }
  0xdb   :  { %v3789_v59 = vpop.permute.xlu1 %1852  ;;  %v2048_v16 = vsel %vm2045_vm12, %v2031_v13, %v1649_v43  ;;  %v2015_v13 = vsel %vm911_vm0, %v2503_v12, %v3745_v51 }
  0xdc   :  { %1782 = vrot.lane.b32.xlu0 %v3777_v28, %s2534_s16 }
  0xdd   :  { %1546 = vrot.lane.b32.xlu1 %v3787_v58, %s2530_s17 }
  0xde   :  { %v3795_v39 = vpop.permute.xlu0 %1838 }
  0xdf   :  { %v3799_v61 = vpop.permute.xlu1 %1602 }
  0xe0   :  { %1844 = vrot.lane.b32.xlu0 %v3689_v18, %s2535_s12  ;;  %v3826_v18 = vld [vmem:[#allocation2 + $0x112] sm:$0xff] }
  0xe1   :  { %1608 = vrot.lane.b32.xlu1 %v3797_v60, %s2531_s18 }
  0xe2   :  { %v1901_v62 = vpop.permute.xlu0 %1900 }
  0xe3   :  { %v1665_v63 = vpop.permute.xlu1 %1664  ;;  %v2114_v57 = vsel %vm2113_vm1, %v2097_v37, %v1901_v62  ;;  %v1356_v62 = vld [vmem:[#allocation2 + $0x10] sm:$0xff] }
  0xe4   :  { %1594 = vrot.lane.b32.xlu0 %v3805_v48, %s2531_s18  ;;  %v2056_v32 = vsel %vm2045_vm12, %v2039_v36, %v1665_v63  ;;  %v1359_v36 = vld [vmem:[#allocation2 + $0x40] sm:$0xff] }
  0xe5   :  { %1798 = vrot.lane.b32.xlu1 %v3797_v60, %s2534_s16 }
  0xe6   :  { %v3813_v6 = vpop.permute.xlu0 %1650 }
  0xe7   :  { %v3815_v11 = vpop.permute.xlu1 %1854 }
  0xe8   :  { %1656 = vrot.lane.b32.xlu0 %v3811_v31, %s2532_s7 }
  0xe9   :  { %1860 = vrot.lane.b32.xlu1 %v3719_v40, %s2535_s12 }
  0xea   :  { %v1713_v17 = vpop.permute.xlu0 %1712 }
  0xeb   :  { %v3829_v19 = vsel %vm2062_vm13, %v2048_v16, %v1713_v17  ;;  %v1917_v20 = vpop.permute.xlu1 %1916  ;;  %v3893_v17 = vld [vmem:[#allocation2 + $0x120] sm:$0xff] }
  0xec   :  { %1846 = vrot.lane.b32.xlu0 %v3811_v31, %s2535_s12 }
  0xed   :  { %1610 = vrot.lane.b32.xlu1 %v3826_v18, %s2531_s18 }
  0xee   :  { %v3839_v25 = vpop.permute.xlu0 %1902 }
  0xef   :  { %v1667_v29 = vpop.permute.xlu1 %1666 }
  0xf0   :  { %1908 = vrot.lane.b32.xlu0 %v3735_v33, %s2536_s8  ;;  %v2020_v33 = vsel %vm911_vm0, %v1363_v35, %v3564_v45  ;;  %v1364_v35 = vld [vmem:[#allocation2 + $0xb0] sm:$0xff] }
  0xf1   :  { %1672 = vrot.lane.b32.xlu1 %v3841_v41, %s2532_s7  ;;  %v2037_v54 = vsel %vm2028_vm11, %v2020_v33, %v3577_v21  ;;  %v2032_v21 = vsel %vm2028_vm11, %v2015_v13, %v3779_v55  ;;  %v1434_v33 = vld [vmem:[#allocation2 + $0x121] sm:$0xff] }
  0xf2   :  { %v1965_v10 = vpop.permute.xlu0 %1964  ;;  %v2054_v63 = vsel %vm2045_vm12, %v2037_v54, %v3704_v30  ;;  %v2013_v30 = vsel %vm911_vm0, %v1356_v62, %v3604_v53  ;;  %v2049_v51 = vsel %vm2045_vm12, %v2032_v21, %v3813_v6  ;;  %v1367_v54 = vld [vmem:[#allocation2 + $0xe0] sm:$0xff] }
  0xf3   :  { %v1729_v49 = vpop.permute.xlu1 %1728  ;;  %v2131_v47 = vsel %vm2130_vm2, %v2114_v57, %v1965_v10  ;;  %v2071_v7 = vsel %vm2062_vm13, %v2054_v63, %v3729_v46  ;;  %v1360_v63 = vld [vmem:[#allocation2 + $0x50] sm:$0xff] }
  0xf4   :  { %v3864_v43 = vsel %vm2062_vm13, %v2056_v32, %v1729_v49  ;;  %1658 = vrot.lane.b32.xlu0 %v3854_v38, %s2532_s7  ;;  %2454 = vmatprep.mubr.msk.f32.mxu0 %vm2159_vm3, %v2131_v47  ;;  %v2088_v14 = vsel %vm2079_vm14, %v2071_v7, %v3755_v50  ;;  %v1459_v7 = vld [vmem:[#allocation2 + $0x90] sm:$0xff] }
  0xf5   :  { %1862 = vrot.lane.b32.xlu1 %v3841_v41, %s2535_s12  ;;  %v2105_v46 = vsel %vm2096_vm15, %v2088_v14, %v3789_v59  ;;  %v1450_v14 = vld [vmem:[#allocation2 + $0x122] sm:$0xff] }
  0xf6   :  { %v1525_v45 = vpop.permute.xlu0 %1524  ;;  %v2122_v50 = vsel %vm2113_vm1, %v2105_v46, %v1917_v20 }
  0xf7   :  { %v1919_v2 = vpop.permute.xlu1 %1918 }
  0xf8   :  { %1720 = vrot.lane.b32.xlu0 %v3769_v27, %s2533_s5 }
  0xf9   :  { %1924 = vrot.lane.b32.xlu1 %v3753_v0, %s2536_s8  ;;  %v2030_v0 = vsel %vm2028_vm11, %v2013_v30, %v3647_v34  ;;  %v2504_v34 = vld [vmem:[#allocation2 + $0xd0] sm:$0xff] }
  0xfa   :  { %v1715_v16 = vpop.permute.xlu0 %1714  ;;  %v2047_v59 = vsel %vm2045_vm12, %v2030_v0, %v3695_v23  ;;  %v2023_v24 = vsel %vm911_vm0, %v2504_v34, %v3763_v52  ;;  %v1426_v23 = vld [vmem:[#allocation2 + $0x81] sm:$0xff] }
  0xfb   :  { %v3897_v22 = vsel %vm2062_vm13, %v2049_v51, %v1715_v16  ;;  %v1981_v55 = vpop.permute.xlu1 %1980  ;;  %v2064_v20 = vsel %vm2062_vm13, %v2047_v59, %v3727_v44  ;;  %v2040_v44 = vsel %vm2028_vm11, %v2023_v24, %v3799_v61  ;;  %v1368_v16 = vld [vmem:[#allocation2 + $0xf0] sm:$0xff] }
  0xfc   :  { %1910 = vrot.lane.b32.xlu0 %v3769_v27, %s2536_s8  ;;  %v2139_v53 = vsel %vm2130_vm2, %v2122_v50, %v1981_v55  ;;  %v2081_v27 = vsel %vm2079_vm14, %v2064_v20, %v3761_v3  ;;  %v1467_v55 = vld [vmem:[#allocation2 + $0x130] sm:$0xff] }
  0xfd   :  { %1674 = vrot.lane.b32.xlu1 %v3893_v17, %s2532_s7  ;;  %2466 = vmatprep.mubr.msk.f32.mxu1 %vm2159_vm3, %v2139_v53  ;;  %v2098_v56 = vsel %vm2096_vm15, %v2081_v27, %v3795_v39  ;;  %v2021_v39 = vsel %vm911_vm0, %v1364_v35, %v3664_v15  ;;  %v1483_v24 = vld [vmem:[#allocation2 + $0x131] sm:$0xff] }
  0xfe   :  { %v3909_v6 = vpop.permute.xlu0 %1776  ;;  %v2115_v3 = vsel %vm2113_vm1, %v2098_v56, %v3839_v25  ;;  %v2038_v61 = vsel %vm2028_vm11, %v2021_v39, %v3684_v9 }
  0xff   :  { %v1541_v26 = vpop.permute.xlu1 %1540 }
 0x100   :  { %1972 = vrot.lane.b32.xlu0 %v3777_v28, %s2537_s9  ;;  %v2057_v28 = vsel %vm2045_vm12, %v2040_v44, %v1667_v29  ;;  %v2055_v29 = vsel %vm2045_vm12, %v2038_v61, %v3721_v42  ;;  %v2016_v42 = vsel %vm911_vm0, %v1359_v36, %v1525_v45  ;;  %v2024_v62 = vsel %vm911_vm0, %v1367_v54, %v1541_v26 }
 0x101   :  { %1736 = vrot.lane.b32.xlu1 %v3787_v58, %s2533_s5  ;;  %v2072_v10 = vsel %vm2062_vm13, %v2055_v29, %v3747_v8 }
 0x102   :  { %v1967_v1 = vpop.permute.xlu0 %1966  ;;  %v2089_v15 = vsel %vm2079_vm14, %v2072_v10, %v3781_v4  ;;  %v1442_v4 = vld [vmem:[#allocation2 + $0x82] sm:$0xff] }
 0x103   :  { %v2132_v5 = vsel %vm2130_vm2, %v2115_v3, %v1967_v1  ;;  %v1731_v52 = vpop.permute.xlu1 %1730  ;;  %v2106_v9 = vsel %vm2096_vm15, %v2089_v15, %v3815_v11 }
 0x104   :  { %v3930_v37 = vsel %vm2062_vm13, %v2057_v28, %v1731_v52  ;;  %1722 = vrot.lane.b32.xlu0 %v1426_v23, %s2533_s5  ;;  %2455 = vmatmul.mubr.msk.f32.vlgmr.msra.gmra.mrb[0].mxu0 %vm2159_vm3, %v2132_v5  ;;  %v2123_v32 = vsel %vm2113_vm1, %v2106_v9, %v1919_v2  ;;  %v1499_v28 = vld [vmem:[#allocation2 + $0x132] sm:$0xff]  ;;  %v2082_v52 = vsel %vm2079_vm14, %v3829_v19, %v3909_v6 }
 0x105   :  { %1926 = vrot.lane.b32.xlu1 %v3787_v58, %s2536_s8 }
 0x106   :  { %v1527_v25 = vpop.permute.xlu0 %1526 }
 0x107   :  { %v3942_v57 = vpop.permute.xlu1 %1792  ;;  %v2017_v12 = vsel %vm911_vm0, %v1360_v63, %v1527_v25 }
 0x108   :  { %1784 = vrot.lane.b32.xlu0 %v3805_v48, %s2534_s16  ;;  %v2090_v19 = vsel %vm2079_vm14, %v3864_v43, %v3942_v57 }
 0x109   :  { %1988 = vrot.lane.b32.xlu1 %v3797_v60, %s2537_s9 }
 0x10a   :  { %v1589_v58 = vpop.permute.xlu0 %1588 }
 0x10b   :  { %v2033_v8 = vsel %vm2028_vm11, %v2016_v42, %v1589_v58  ;;  %v1983_v49 = vpop.permute.xlu1 %1982 }
 0x10c   :  { %v2140_v47 = vsel %vm2130_vm2, %v2123_v32, %v1983_v49  ;;  %1974 = vrot.lane.b32.xlu0 %v3805_v48, %s2537_s9 }
 0x10d   :  { %1738 = vrot.lane.b32.xlu1 %v1434_v33, %s2533_s5  ;;  %2467 = vmatmul.mubr.msk.f32.vlgmr.msra.gmra.mrb[0].mxu1 %vm2159_vm3, %v2140_v47 }
 0x10e   :  { %v3962_v60 = vpop.permute.xlu0 %1778 }
 0x10f   :  { %v1543_v11 = vpop.permute.xlu1 %1542 }
 0x110   :  { %1786 = vrot.lane.b32.xlu0 %v1442_v4, %s2534_s16  ;;  %v2025_v53 = vsel %vm911_vm0, %v1368_v16, %v1543_v11  ;;  %v2083_v11 = vsel %vm2079_vm14, %v3897_v22, %v3962_v60 }
 0x111   :  { %1800 = vrot.lane.b32.xlu1 %v3826_v18, %s2534_s16 }
 0x112   :  { %v1841_v45 = vpop.permute.xlu0 %1840 }
 0x113   :  { %v1605_v2 = vpop.permute.xlu1 %1604  ;;  %v2099_v61 = vsel %vm2096_vm15, %v2082_v52, %v1841_v45 }
 0x114   :  { %v2041_v48 = vsel %vm2028_vm11, %v2024_v62, %v1605_v2  ;;  %1848 = vrot.lane.b32.xlu0 %v3854_v38, %s2535_s12 }
 0x115   :  { %1990 = vrot.lane.b32.xlu1 %v3826_v18, %s2537_s9  ;;  %v1475_v18 = vld [vmem:[#allocation2 + $0x91] sm:$0xff] }
 0x116   :  { %v1591_v13 = vpop.permute.xlu0 %1590 }
 0x117   :  { %v2034_v21 = vsel %vm2028_vm11, %v2017_v12, %v1591_v13  ;;  %v3975_v30 = vpop.permute.xlu1 %1794 }
 0x118   :  { %1850 = vrot.lane.b32.xlu0 %v1459_v7, %s2535_s12  ;;  %v2091_v22 = vsel %vm2079_vm14, %v3930_v37, %v3975_v30 }
 0x119   :  { %1802 = vrot.lane.b32.xlu1 %v1450_v14, %s2534_s16 }
 0x11a   :  { %v1653_v46 = vpop.permute.xlu0 %1652 }
 0x11b   :  { %v2050_v51 = vsel %vm2045_vm12, %v2033_v8, %v1653_v46  ;;  %v1857_v38 = vpop.permute.xlu1 %1856 }
 0x11c   :  { %1912 = vrot.lane.b32.xlu0 %v1426_v23, %s2536_s8  ;;  %v2107_v6 = vsel %vm2096_vm15, %v2090_v19, %v1857_v38 }
 0x11d   :  { %1864 = vrot.lane.b32.xlu1 %v3893_v17, %s2535_s12  ;;  %v1491_v17 = vld [vmem:[#allocation2 + $0x92] sm:$0xff] }
 0x11e   :  { %v1843_v50 = vpop.permute.xlu0 %1842 }
 0x11f   :  { %v1607_v0 = vpop.permute.xlu1 %1606  ;;  %v2100_v43 = vsel %vm2096_vm15, %v2083_v11, %v1843_v50 }
 0x120   :  { %v2042_v59 = vsel %vm2028_vm11, %v2025_v53, %v1607_v0  ;;  %1914 = vrot.lane.b32.xlu0 %v1475_v18, %s2536_s8 }
 0x121   :  { %1866 = vrot.lane.b32.xlu1 %v1467_v55, %s2535_s12 }
 0x122   :  { %v1905_v20 = vpop.permute.xlu0 %1904 }
 0x123   :  { %v1669_v26 = vpop.permute.xlu1 %1668  ;;  %v2116_v25 = vsel %vm2113_vm1, %v2099_v61, %v1905_v20 }
 0x124   :  { %v2058_v27 = vsel %vm2045_vm12, %v2041_v48, %v1669_v26  ;;  %1976 = vrot.lane.b32.xlu0 %v1442_v4, %s2537_s9  ;;  %v1361_v48 = vld [vmem:[#allocation2 + $0x60] sm:$0xff] }
 0x125   :  { %1928 = vrot.lane.b32.xlu1 %v1434_v33, %s2536_s8 }
 0x126   :  { %v1655_v34 = vpop.permute.xlu0 %1654 }
 0x127   :  { %v2051_v56 = vsel %vm2045_vm12, %v2034_v21, %v1655_v34  ;;  %v1859_v23 = vpop.permute.xlu1 %1858 }
 0x128   :  { %1978 = vrot.lane.b32.xlu0 %v1491_v17, %s2537_s9  ;;  %v2108_v60 = vsel %vm2096_vm15, %v2091_v22, %v1859_v23 }
 0x129   :  { %1930 = vrot.lane.b32.xlu1 %v1483_v24, %s2536_s8 }
 0x12a   :  { %v1717_v35 = vpop.permute.xlu0 %1716 }
 0x12b   :  { %v3994_v44 = vsel %vm2062_vm13, %v2050_v51, %v1717_v35  ;;  %v1921_v3 = vpop.permute.xlu1 %1920 }
 0x12c   :  { %v2124_v33 = vsel %vm2113_vm1, %v2107_v6, %v1921_v3 }
 0x12d   :  { %1992 = vrot.lane.b32.xlu1 %v1450_v14, %s2537_s9 }
 0x12e   :  { %v1907_v1 = vpop.permute.xlu0 %1906 }
 0x12f   :  { %v1671_v5 = vpop.permute.xlu1 %1670  ;;  %v2117_v57 = vsel %vm2113_vm1, %v2100_v43, %v1907_v1 }
 0x130   :  { %v2059_v39 = vsel %vm2045_vm12, %v2042_v59, %v1671_v5 }
 0x131   :  { %1994 = vrot.lane.b32.xlu1 %v1499_v28, %s2537_s9 }
 0x132   :  { %v1969_v29 = vpop.permute.xlu0 %1968 }
 0x133   :  { %v2133_v36 = vsel %vm2130_vm2, %v2116_v25, %v1969_v29  ;;  %v1733_v10 = vpop.permute.xlu1 %1732 }
 0x134   :  { %v4006_v15 = vsel %vm2062_vm13, %v2058_v27, %v1733_v10  ;;  %2457 = vmatprep.mubr.msk.f32.mxu0 %vm2159_vm3, %v2133_v36 }
 0x136   :  { %v1529_v9 = vpop.permute.xlu0 %1528 }
 0x137   :  { %v1923_v42 = vpop.permute.xlu1 %1922  ;;  %v2018_v12 = vsel %vm911_vm0, %v1361_v48, %v1529_v9 }
 0x138   :  { %v2125_v14 = vsel %vm2113_vm1, %v2108_v60, %v1923_v42 }
 0x13a   :  { %v1719_v58 = vpop.permute.xlu0 %1718 }
 0x13b   :  { %v2068_v32 = vsel %vm2062_vm13, %v2051_v56, %v1719_v58  ;;  %v1985_v8 = vpop.permute.xlu1 %1984 }
 0x13c   :  { %v2141_v49 = vsel %vm2130_vm2, %v2124_v33, %v1985_v8 }
 0x13d   :  { %2469 = vmatprep.mubr.msk.f32.mxu1 %vm2159_vm3, %v2141_v49 }
 0x13e   :  { %v1781_v47 = vpop.permute.xlu0 %1780 }
 0x13f   :  { %v1545_v4 = vpop.permute.xlu1 %1544  ;;  %v2084_v3 = vsel %vm2079_vm14, %v3994_v44, %v1781_v47 }
 0x140   :  { %v2026_v37 = vsel %vm911_vm0, %v3719_v40, %v1545_v4 }
 0x142   :  { %v1971_v54 = vpop.permute.xlu0 %1970 }
 0x143   :  { %v2134_v45 = vsel %vm2130_vm2, %v2117_v57, %v1971_v54  ;;  %v1735_v62 = vpop.permute.xlu1 %1734 }
 0x144   :  { %v2076_v63 = vsel %vm2062_vm13, %v2059_v39, %v1735_v62  ;;  %2458 = vmatmul.mubr.msk.f32.gmra.mrb[2].mxu0 %vm2159_vm3, %v2134_v45 }
 0x146   :  { %v4025_v2 = vpop.permute.xlu0 %1530 }
 0x147   :  { %v1797_v7 = vpop.permute.xlu1 %1796 }
 0x148   :  { %v2092_v29 = vsel %vm2079_vm14, %v4006_v15, %v1797_v7 }
 0x14a   :  { %v1593_v13 = vpop.permute.xlu0 %1592 }
 0x14b   :  { %v2035_v21 = vsel %vm2028_vm11, %v2018_v12, %v1593_v13  ;;  %v1987_v46 = vpop.permute.xlu1 %1986  ;;  %v2019_v13 = vsel %vm911_vm0, %v3811_v31, %v4025_v2 }
 0x14c   :  { %v2142_v51 = vsel %vm2130_vm2, %v2125_v14, %v1987_v46 }
 0x14d   :  { %2470 = vmatmul.mubr.msk.f32.gmra.mrb[2].mxu1 %vm2159_vm3, %v2142_v51 }
 0x14e   :  { %v1783_v38 = vpop.permute.xlu0 %1782 }
 0x14f   :  { %v4036_v16 = vpop.permute.xlu1 %1546  ;;  %v2085_v42 = vsel %vm2079_vm14, %v2068_v32, %v1783_v38 }
 0x152   :  { %v1845_v18 = vpop.permute.xlu0 %1844 }
 0x153   :  { %v1609_v30 = vpop.permute.xlu1 %1608  ;;  %v2101_v1 = vsel %vm2096_vm15, %v2084_v3, %v1845_v18 }
 0x154   :  { %v4041_v50 = vsel %vm2028_vm11, %v2026_v37, %v1609_v30 }
 0x156   :  { %v1595_v55 = vpop.permute.xlu0 %1594 }
 0x157   :  { %v1799_v53 = vpop.permute.xlu1 %1798  ;;  %v2036_v46 = vsel %vm2028_vm11, %v2019_v13, %v1595_v55 }
 0x158   :  { %v2093_v4 = vsel %vm2079_vm14, %v2076_v63, %v1799_v53 }
 0x15a   :  { %v1657_v0 = vpop.permute.xlu0 %1656 }
 0x15b   :  { %v1861_v59 = vpop.permute.xlu1 %1860  ;;  %v2052_v22 = vsel %vm2045_vm12, %v2035_v21, %v1657_v0 }
 0x15c   :  { %v2109_v36 = vsel %vm2096_vm15, %v2092_v29, %v1861_v59 }
 0x15e   :  { %v1847_v20 = vpop.permute.xlu0 %1846 }
 0x15f   :  { %v4043_v26 = vpop.permute.xlu1 %1610  ;;  %v2102_v6 = vsel %vm2096_vm15, %v2085_v42, %v1847_v20 }
 0x162   :  { %v1909_v27 = vpop.permute.xlu0 %1908 }
 0x163   :  { %v4045_v17 = vpop.permute.xlu1 %1672  ;;  %v2118_v28 = vsel %vm2113_vm1, %v2101_v1, %v1909_v27 }
 0x164   :  { %v2060_v59 = vsel %vm2045_vm12, %v4041_v50, %v4045_v17 }
 0x166   :  { %v1659_v34 = vpop.permute.xlu0 %1658 }
 0x167   :  { %v1863_v24 = vpop.permute.xlu1 %1862  ;;  %v2053_v38 = vsel %vm2045_vm12, %v2036_v46, %v1659_v34 }
 0x168   :  { %v2110_v32 = vsel %vm2096_vm15, %v2093_v4, %v1863_v24  ;;  %v2027_v24 = vsel %vm911_vm0, %v3841_v41, %v4036_v16 }
 0x16a   :  { %v1721_v56 = vpop.permute.xlu0 %1720 }
 0x16b   :  { %v1925_v23 = vpop.permute.xlu1 %1924  ;;  %v2069_v12 = vsel %vm2062_vm13, %v2052_v22, %v1721_v56 }
 0x16c   :  { %v2126_v44 = vsel %vm2113_vm1, %v2109_v36, %v1925_v23  ;;  %v2044_v23 = vsel %vm2028_vm11, %v2027_v24, %v4043_v26 }
 0x16e   :  { %v1911_v35 = vpop.permute.xlu0 %1910 }
 0x16f   :  { %v4047_v40 = vpop.permute.xlu1 %1674  ;;  %v2119_v58 = vsel %vm2113_vm1, %v2102_v6, %v1911_v35 }
 0x170   :  { %v2061_v50 = vsel %vm2045_vm12, %v2044_v23, %v4047_v40  ;;  %v2405_v40 = vld [vmem:[%s4145_s2] ss:$0 sm:$0xff]  ;;  %s2538_s2 = smov [#allocation3]  }
 0x171   :  { %s2394_s7 = sshll.u32 %s2538_s2, 4  ;;  %s2395_s7 = int_to_ptr.vmem [resolvable:$true] %s2394_s7 }
 0x172   :  { %v1973_v5 = vpop.permute.xlu0 %1972  ;;  %s2505_s5 = scalar_lea.vmem %s2395_s7, 2048  ;;  %p2510_p1 = scmp.lt.s32.totalorder %s2395_s7, %s2395_s7 }
 0x173   :  { %v2135_v52 = vsel %vm2130_vm2, %v2118_v28, %v1973_v5  ;;  %v1737_v39 = vpop.permute.xlu1 %1736  ;;  %p2506_p0 = scmp.ne.s32.totalorder %s2395_s7, %s2505_s5  ;;  %p2511_p2 = scmp.lt.s32.totalorder %s2505_s5, %s2505_s5 }
 0x174   :  { %2460 = vmatprep.mubr.msk.f32.mxu0 %vm2159_vm3, %v2135_v52  ;;  %v2077_v34 = vsel %vm2062_vm13, %v2060_v59, %v1737_v39 }
 0x175   :  { %p2512_p3 = por %p2511_p2, %p2510_p1 }
 0x176   :  { %v1723_v61 = vpop.permute.xlu0 %1722 }
 0x177   :  { %v1927_v25 = vpop.permute.xlu1 %1926  ;;  %v2070_v21 = vsel %vm2062_vm13, %v2053_v38, %v1723_v61  ;;  %p2513_p4 = pnand %p2512_p3, %p2506_p0 }
 0x178   :  { %v2127_v43 = vsel %vm2113_vm1, %v2110_v32, %v1927_v25 }
 0x17a   :  { %v1785_v10 = vpop.permute.xlu0 %1784 }
 0x17b   :  { %v1989_v9 = vpop.permute.xlu1 %1988  ;;  %v2086_v14 = vsel %vm2079_vm14, %v2069_v12, %v1785_v10 }
 0x17c   :  { %v2143_v19 = vsel %vm2130_vm2, %v2126_v44, %v1989_v9 }
 0x17d   :  { %2472 = vmatprep.mubr.msk.f32.mxu1 %vm2159_vm3, %v2143_v19 }
 0x17e   :  { %v1975_v33 = vpop.permute.xlu0 %1974 }
 0x17f   :  { %v2136_v8 = vsel %vm2130_vm2, %v2119_v58, %v1975_v33  ;;  %v1739_v15 = vpop.permute.xlu1 %1738 }
 0x180   :  { %2461 = vmatmul.mubr.msk.f32.gmra.mrb[4].mxu0 %vm2159_vm3, %v2136_v8  ;;  %v2078_v1 = vsel %vm2062_vm13, %v2061_v50, %v1739_v15 }
 0x182   :  { %v1787_v49 = vpop.permute.xlu0 %1786 }
 0x183   :  { %v1801_v47 = vpop.permute.xlu1 %1800  ;;  %v2087_v0 = vsel %vm2079_vm14, %v2070_v21, %v1787_v49 }
 0x184   :  { %v2094_v56 = vsel %vm2079_vm14, %v2077_v34, %v1801_v47 }
 0x186   :  { %v1849_v11 = vpop.permute.xlu0 %1848 }
 0x187   :  { %v1991_v57 = vpop.permute.xlu1 %1990  ;;  %v2103_v51 = vsel %vm2096_vm15, %v2086_v14, %v1849_v11 }
 0x188   :  { %v2144_v54 = vsel %vm2130_vm2, %v2127_v43, %v1991_v57 }
 0x189   :  { %2473 = vmatmul.mubr.msk.f32.gmra.mrb[4].mxu1 %vm2159_vm3, %v2144_v54 }
 0x18a   :  { %v1851_v45 = vpop.permute.xlu0 %1850 }
 0x18b   :  { %v1803_v62 = vpop.permute.xlu1 %1802  ;;  %v2104_v31 = vsel %vm2096_vm15, %v2087_v0, %v1851_v45 }
 0x18c   :  { %v2095_v5 = vsel %vm2079_vm14, %v2078_v1, %v1803_v62 }
 0x18e   :  { %v1913_v48 = vpop.permute.xlu0 %1912 }
 0x18f   :  { %v1865_v7 = vpop.permute.xlu1 %1864  ;;  %v2120_v18 = vsel %vm2113_vm1, %v2103_v51, %v1913_v48 }
 0x190   :  { %v2111_v35 = vsel %vm2096_vm15, %v2094_v56, %v1865_v7 }
 0x192   :  { %v1915_v60 = vpop.permute.xlu0 %1914 }
 0x193   :  { %v1867_v63 = vpop.permute.xlu1 %1866  ;;  %v2121_v2 = vsel %vm2113_vm1, %v2104_v31, %v1915_v60 }
 0x194   :  { %v2112_v41 = vsel %vm2096_vm15, %v2095_v5, %v1867_v63 }
 0x196   :  { %v1977_v37 = vpop.permute.xlu0 %1976 }
 0x197   :  { %v2137_v30 = vsel %vm2130_vm2, %v2120_v18, %v1977_v37  ;;  %v1929_v53 = vpop.permute.xlu1 %1928 }
 0x198   :  { %2463 = vmatprep.mubr.msk.f32.mxu0 %vm2159_vm3, %v2137_v30  ;;  %v2128_v17 = vsel %vm2113_vm1, %v2111_v35, %v1929_v53 }
 0x19a   :  { %v1979_v55 = vpop.permute.xlu0 %1978 }
 0x19b   :  { %v2138_v20 = vsel %vm2130_vm2, %v2121_v2, %v1979_v55  ;;  %v1931_v27 = vpop.permute.xlu1 %1930 }
 0x19c   :  { %2464 = vmatmul.mubr.msk.f32.gmra.mrb[6].mxu0 %vm2159_vm3, %v2138_v20  ;;  %v2129_v16 = vsel %vm2113_vm1, %v2112_v41, %v1931_v27 }
 0x19f   :  { %v1993_v3 = vpop.permute.xlu1 %1992 }
 0x1a0   :  { %v2145_v28 = vsel %vm2130_vm2, %v2128_v17, %v1993_v3 }
 0x1a1   :  { %2475 = vmatprep.mubr.msk.f32.mxu1 %vm2159_vm3, %v2145_v28 }
 0x1a3   :  { %v1995_v26 = vpop.permute.xlu1 %1994 }
 0x1a4   :  { %v2146_v52 = vsel %vm2130_vm2, %v2129_v16, %v1995_v26 }
 0x1a5   :  { %2476 = vmatmul.mubr.msk.f32.gmra.mrb[6].mxu1 %vm2159_vm3, %v2146_v52 }
 0x1d7   :  { %v2456_v39 = vpop.f32.mrb[0].mxu0 }
 0x1d8   :  { %v2284_v61 = vadd.f32 %v2456_v39, %v2405_v40  ;;  %v2278_v25 = vpop.f32.mrb[1].mxu0 }
 0x1d9   :  { %v2279_v29 = vadd.f32 %v2405_v40, %v2278_v25 }
 0x1da   :  { %v2358_v36 = vmax.f32 %v2284_v61, 0.0 }
 0x1db   :  { %v2357_v10 = vmax.f32 %v2279_v29, 0.0 }
 0x1dc   :  { %2374 = vst.msk [vmem:[#allocation3 + $0x8] sm:$0xff] %vm2028_vm11, %v2358_v36 }
 0x1dd   :  { %2373 = vst.msk [vmem:[#allocation3] sm:$0xff] %vm2028_vm11, %v2357_v10 }
 0x1e0   :  { %v2468_v44 = vpop.f32.mrb[0].mxu1 }
 0x1e1   :  { %v2324_v9 = vadd.f32 %v2468_v44, %v2405_v40  ;;  %v2318_v42 = vpop.f32.mrb[1].mxu1 }
 0x1e2   :  { %v2319_v19 = vadd.f32 %v2405_v40, %v2318_v42 }
 0x1e3   :  { %v2366_v6 = vmax.f32 %v2324_v9, 0.0 }
 0x1e4   :  { %v2365_v58 = vmax.f32 %v2319_v19, 0.0 }
 0x1e5   :  { %2382 = vst.msk [vmem:[#allocation3 + $0x48] sm:$0xff] %vm2028_vm11, %v2366_v6 }
 0x1e6   :  { %2381 = vst.msk [vmem:[#allocation3 + $0x40] sm:$0xff] %vm2028_vm11, %v2365_v58 }
 0x217   :  { %v2459_v33 = vpop.f32.mrb[2].mxu0 }
 0x218   :  { %v2294_v8 = vadd.f32 %v2459_v33, %v2405_v40  ;;  %v2288_v15 = vpop.f32.mrb[3].mxu0 }
 0x219   :  { %v2289_v49 = vadd.f32 %v2405_v40, %v2288_v15 }
 0x21a   :  { %v2360_v47 = vmax.f32 %v2294_v8, 0.0 }
 0x21b   :  { %v2359_v4 = vmax.f32 %v2289_v49, 0.0 }
 0x21c   :  { %2376 = vst.msk [vmem:[#allocation3 + $0x18] sm:$0xff] %vm2028_vm11, %v2360_v47 }
 0x21d   :  { %2375 = vst.msk [vmem:[#allocation3 + $0x10] sm:$0xff] %vm2028_vm11, %v2359_v4 }
 0x220   :  { %v2471_v32 = vpop.f32.mrb[2].mxu1 }
 0x221   :  { %v2334_v11 = vadd.f32 %v2471_v32, %v2405_v40  ;;  %v2328_v43 = vpop.f32.mrb[3].mxu1 }
 0x222   :  { %v2329_v57 = vadd.f32 %v2405_v40, %v2328_v43 }
 0x223   :  { %v2368_v54 = vmax.f32 %v2334_v11, 0.0 }
 0x224   :  { %v2367_v45 = vmax.f32 %v2329_v57, 0.0 }
 0x225   :  { %2384 = vst.msk [vmem:[#allocation3 + $0x58] sm:$0xff] %vm2028_vm11, %v2368_v54 }
 0x226   :  { %2383 = vst.msk [vmem:[#allocation3 + $0x50] sm:$0xff] %vm2028_vm11, %v2367_v45 }
 0x253   :  { %v2462_v62 = vpop.f32.mrb[4].mxu0 }
 0x254   :  { %v2304_v48 = vadd.f32 %v2462_v62, %v2405_v40  ;;  %v2298_v7 = vpop.f32.mrb[5].mxu0 }
 0x255   :  { %v2299_v22 = vadd.f32 %v2405_v40, %v2298_v7 }
 0x256   :  { %v2362_v60 = vmax.f32 %v2304_v48, 0.0 }
 0x257   :  { %v2361_v12 = vmax.f32 %v2299_v22, 0.0 }
 0x258   :  { %2378 = vst.msk [vmem:[#allocation3 + $0x28] sm:$0xff] %vm2028_vm11, %v2362_v60 }
 0x259   :  { %2377 = vst.msk [vmem:[#allocation3 + $0x20] sm:$0xff] %vm2028_vm11, %v2361_v12 }
 0x25c   :  { %v2474_v63 = vpop.f32.mrb[4].mxu1 }
 0x25d   :  { %v2344_v13 = vadd.f32 %v2474_v63, %v2405_v40  ;;  %v2338_v14 = vpop.f32.mrb[5].mxu1 }
 0x25e   :  { %v2339_v46 = vadd.f32 %v2405_v40, %v2338_v14 }
 0x25f   :  { %v2370_v51 = vmax.f32 %v2344_v13, 0.0 }
 0x260   :  { %v2369_v38 = vmax.f32 %v2339_v46, 0.0 }
 0x261   :  { %2386 = vst.msk [vmem:[#allocation3 + $0x68] sm:$0xff] %vm2028_vm11, %v2370_v51 }
 0x262   :  { %2385 = vst.msk [vmem:[#allocation3 + $0x60] sm:$0xff] %vm2028_vm11, %v2369_v38 }
 0x26f   :  { %v2465_v18 = vpop.f32.mrb[6].mxu0 }
 0x270   :  { %v2314_v37 = vadd.f32 %v2465_v18, %v2405_v40  ;;  %v2308_v21 = vpop.f32.mrb[7].mxu0 }
 0x271   :  { %v2309_v30 = vadd.f32 %v2405_v40, %v2308_v21 }
 0x272   :  { %v2364_v53 = vmax.f32 %v2314_v37, 0.0 }
 0x273   :  { %v2363_v0 = vmax.f32 %v2309_v30, 0.0 }
 0x274   :  { %2380 = vst.msk [vmem:[#allocation3 + $0x38] sm:$0xff] %vm2028_vm11, %v2364_v53 }
 0x275   :  { %2379 = vst.msk [vmem:[#allocation3 + $0x30] sm:$0xff] %vm2028_vm11, %v2363_v0 }
 0x278   :  { %v2477_v31 = vpop.f32.mrb[6].mxu1 }
 0x279   :  { %v2354_v2 = vadd.f32 %v2477_v31, %v2405_v40  ;;  %v2348_v55 = vpop.f32.mrb[7].mxu1 }
 0x27a   :  { %v2349_v59 = vadd.f32 %v2405_v40, %v2348_v55 }
 0x27b   :  { %v2372_v20 = vmax.f32 %v2354_v2, 0.0 }
 0x27c   :  { %v2371_v27 = vmax.f32 %v2349_v59, 0.0 }
 0x27d   :  { %2388 = vst.msk [vmem:[#allocation3 + $0x78] sm:$0xff] %vm2028_vm11, %v2372_v20 }
 0x27e   :  { %2387 = vst.msk [vmem:[#allocation3 + $0x70] sm:$0xff] %vm2028_vm11, %v2371_v27 }
 0x27f   :  { %2516 = shalt.err (!%p2513_p4)
}
 0x280   :  { %s2517_s8 = scalar_lea.hbm %s4146_s3, 2048 }
 0x281   :  { %p2518_p5 = scmp.ne.s32.totalorder %s4146_s3, %s2517_s8  ;;  %p2521_p6 = scmp.lt.u32.totalorder %s2517_s8, %s4146_s3 }
 0x283   :  { %p2523_p7 = pnand %p2521_p6, %p2518_p5 }
 0x285   :  { %2526 = shalt.err (!%p2523_p7)
}
 0x286   :  { %s2539_s21 = smov 128  }
 0x287   :  { %2400 = dma.vmem_to_hbm [thread:$0]  %s2395_s7, 2048, %s4146_s3, [#allocation4], %s2539_s21, %s2539_s21, %s2531_s18  }
 0x288   :  { %2527 = dma.done.wait [#allocation4], 2048  }
 0x289   :  { %2528 = vsyncadd [#allocation4], 4294965248 }
 0x28a   :  { %2404 = vsyncpa [#allocation4], 1 }

</bundles_post_ra>
